<compile_context>
chip_gen: v6e
topology: v6e:2x2x1
jax: 0.10.0
libtpu: 0.0.40
codegen_flags: <defaults>
</compile_context>

<pallas_src>
import math
import jax
import jax.numpy as jnp
from jax.experimental import pallas as pl
from jax.experimental.pallas import tpu as pltpu

IN_FEATURES = 768
HIDDEN = 1024


def mlp_kernel(x_ref, w1_ref, b1_ref, w2_ref, b2_ref, o_ref):
    # Layer 1: bf16 MXU operands, f32 accumulation; bias + tanh in f32.
    h1 = jnp.dot(x_ref[...], w1_ref[...], preferred_element_type=jnp.float32)
    h1 = jnp.tanh(h1 + b1_ref[...])
    # Layer 2: cast activations back to bf16 for the MXU, accumulate in f32.
    y = jnp.dot(h1.astype(jnp.bfloat16), w2_ref[...],
                preferred_element_type=jnp.float32)
    o_ref[...] = jnp.tanh(y + b2_ref[...]).astype(o_ref.dtype)


def mlp_forward(x, w1, b1, w2, b2):
    """o = tanh(tanh(x @ W1 + b1) @ W2 + b2).

    Expects parameters already in kernel dtypes (created via `init_linear`):
      w1: (768, 1024) bf16, w2: (1024, out) bf16, b1/b2: (1, N) f32.
    """
    B = x.shape[0]
    out_features = w2.shape[1]
    assert w1.shape == (IN_FEATURES, HIDDEN) and w1.dtype == jnp.bfloat16
    assert w2.shape[0] == HIDDEN and w2.dtype == jnp.bfloat16
    assert b1.shape == (1, HIDDEN) and b1.dtype == jnp.float32
    assert b2.shape == (1, out_features) and b2.dtype == jnp.float32

    # Pad batch rows to a multiple of 16 (bf16 sublane packing); activations
    # are tiny, so this costs nothing.
    b_pad = max(16, ((B + 15) // 16) * 16)
    if b_pad != B:
        x = jnp.pad(x, ((0, b_pad - B), (0, 0)))
    x_bf = x.astype(jnp.bfloat16)

    flops = 2 * b_pad * (IN_FEATURES * HIDDEN + HIDDEN * out_features)
    transcendentals = b_pad * (HIDDEN + out_features)
    bytes_accessed = (x_bf.size * 2 + w1.size * 2 + w2.size * 2
                      + b1.size * 4 + b2.size * 4
                      + b_pad * out_features * 4)

    out = pl.pallas_call(
        mlp_kernel,
        out_shape=jax.ShapeDtypeStruct((b_pad, out_features), jnp.float32),
        grid_spec=pltpu.PrefetchScalarGridSpec(
            num_scalar_prefetch=0,
            grid=(1,),  # single step: no accumulator, no init/finalize
            in_specs=[
                pl.BlockSpec((b_pad, IN_FEATURES), lambda i: (0, 0)),      # x
                pl.BlockSpec((IN_FEATURES, HIDDEN), lambda i: (0, 0)),     # W1
                pl.BlockSpec((1, HIDDEN), lambda i: (0, 0)),               # b1
                pl.BlockSpec((HIDDEN, out_features), lambda i: (0, 0)),    # W2
                pl.BlockSpec((1, out_features), lambda i: (0, 0)),         # b2
            ],
            out_specs=pl.BlockSpec((b_pad, out_features), lambda i: (0, 0)),
        ),
        compiler_params=pltpu.CompilerParams(
            dimension_semantics=("arbitrary",),
        ),
        cost_estimate=pl.CostEstimate(
            flops=flops,
            transcendentals=transcendentals,
            bytes_accessed=bytes_accessed,
        ),
    )(x_bf, w1, b1, w2, b2)

    return out[:B]


def mlp_reference_bf16(x, w1, b1, w2, b2):
    """Matching-precision reference (bf16 MXU inputs, f32 accumulation)."""
    h = jnp.dot(x.astype(jnp.bfloat16), w1,
                preferred_element_type=jnp.float32)
    h = jnp.tanh(h + b1)
    y = jnp.dot(h.astype(jnp.bfloat16), w2,
                preferred_element_type=jnp.float32)
    return jnp.tanh(y + b2)


def init_linear(key, in_features, out_features):
    """nn.Linear-style init; weights stored ONCE in kernel dtype (bf16)."""
    kw, kb = jax.random.split(key)
    bound = 1.0 / math.sqrt(in_features)
    # Stored as [in, out] so the kernel does x @ W directly (== x @ W_torch.T).
    w = jax.random.uniform(kw, (in_features, out_features),
                           minval=-bound, maxval=bound, dtype=jnp.float32)
    b = jax.random.uniform(kb, (1, out_features),
                           minval=-bound, maxval=bound, dtype=jnp.float32)
    return w.astype(jnp.bfloat16), b  # kernel dtypes: bf16 weight, f32 bias


if __name__ == "__main__":
    key = jax.random.PRNGKey(0)
    k_x, k_l1, k_l2 = jax.random.split(key, 3)

    B = 2
    OUT = 128  # output_size

    x = jax.random.normal(k_x, (B, IN_FEATURES), dtype=jnp.float32)
    w1, b1 = init_linear(k_l1, IN_FEATURES, HIDDEN)
    w2, b2 = init_linear(k_l2, HIDDEN, OUT)

    out = mlp_forward(x, w1, b1, w2, b2)
    out = jax.block_until_ready(out)
    assert out.shape == (B, OUT)

    # Exact-ish check against a matching-precision (bf16-input / f32-acc) reference.
    ref_bf16 = mlp_reference_bf16(x, w1, b1, w2, b2)
    assert jnp.allclose(out, ref_bf16, atol=1e-4, rtol=1e-4), \
        float(jnp.max(jnp.abs(out - ref_bf16)))

    # Loose check against the full-f32 PyTorch-equivalent reference.
    ref_f32 = jnp.tanh(jnp.tanh(x @ w1.astype(jnp.float32) + b1)
                       @ w2.astype(jnp.float32) + b2)
    assert jnp.allclose(out, ref_f32, atol=2e-2, rtol=2e-2), \
        float(jnp.max(jnp.abs(out - ref_f32)))

    print("KERNEL_OK")
</pallas_src>

<mosaic_0001>
module attributes {stable_mosaic.version = 11 : i64} {
  func.func @mlp_kernel(%arg0: i32, %arg1: memref<16x768xbf16, #tpu.memory_space<vmem>>, %arg2: memref<768x1024xbf16, #tpu.memory_space<vmem>>, %arg3: memref<1x1024xf32, #tpu.memory_space<vmem>>, %arg4: memref<1024x128xbf16, #tpu.memory_space<vmem>>, %arg5: memref<1x128xf32, #tpu.memory_space<vmem>>, %arg6: memref<16x128xf32, #tpu.memory_space<vmem>>) attributes {dimension_semantics = [#tpu.dimension_semantics<arbitrary>], iteration_bounds = array<i64: 1>, scalar_prefetch = 0 : i64, scratch_operands = 0 : i64, tpu.core_type = #tpu.core_type<tc>, window_params = [{pipeline_mode = #tpu.pipeline_mode<synchronous>, transform_indices = @transform_0, window_bounds = array<i64: 16, 768>}, {pipeline_mode = #tpu.pipeline_mode<synchronous>, transform_indices = @transform_1, window_bounds = array<i64: 768, 1024>}, {pipeline_mode = #tpu.pipeline_mode<synchronous>, transform_indices = @transform_2, window_bounds = array<i64: 1, 1024>}, {pipeline_mode = #tpu.pipeline_mode<synchronous>, transform_indices = @transform_3, window_bounds = array<i64: 1024, 128>}, {pipeline_mode = #tpu.pipeline_mode<synchronous>, transform_indices = @transform_4, window_bounds = array<i64: 1, 128>}, {pipeline_mode = #tpu.pipeline_mode<synchronous>, transform_indices = @transform_5, window_bounds = array<i64: 16, 128>}]} {
    %c0 = arith.constant 0 : index
    %c0_0 = arith.constant 0 : index
    %0 = vector.load %arg1[%c0, %c0_0] : memref<16x768xbf16, #tpu.memory_space<vmem>>, vector<16x768xbf16>
    %c0_1 = arith.constant 0 : index
    %c0_2 = arith.constant 0 : index
    %1 = vector.load %arg2[%c0_1, %c0_2] : memref<768x1024xbf16, #tpu.memory_space<vmem>>, vector<768x1024xbf16>
    %cst = arith.constant dense<0.000000e+00> : vector<16x1024xf32>
    %2 = tpu.matmul %0, %1, %cst {dimension_numbers = #tpu.dot_dimension_numbers<[1], [0], [0], [1], [0, 0, 1, 1], [], []>} : vector<16x768xbf16>, vector<768x1024xbf16>, vector<16x1024xf32> -> vector<16x1024xf32>
    %c0_3 = arith.constant 0 : index
    %c0_4 = arith.constant 0 : index
    %3 = vector.load %arg3[%c0_3, %c0_4] : memref<1x1024xf32, #tpu.memory_space<vmem>>, vector<1x1024xf32>
    %4 = vector.broadcast %3 : vector<1x1024xf32> to vector<16x1024xf32>
    %5 = arith.addf %2, %4 : vector<16x1024xf32>
    %6 = math.tanh %5 : vector<16x1024xf32>
    %7 = arith.truncf %6 : vector<16x1024xf32> to vector<16x1024xbf16>
    %c0_5 = arith.constant 0 : index
    %c0_6 = arith.constant 0 : index
    %8 = vector.load %arg4[%c0_5, %c0_6] : memref<1024x128xbf16, #tpu.memory_space<vmem>>, vector<1024x128xbf16>
    %cst_7 = arith.constant dense<0.000000e+00> : vector<16x128xf32>
    %9 = tpu.matmul %7, %8, %cst_7 {dimension_numbers = #tpu.dot_dimension_numbers<[1], [0], [0], [1], [0, 0, 1, 1], [], []>} : vector<16x1024xbf16>, vector<1024x128xbf16>, vector<16x128xf32> -> vector<16x128xf32>
    %c0_8 = arith.constant 0 : index
    %c0_9 = arith.constant 0 : index
    %10 = vector.load %arg5[%c0_8, %c0_9] : memref<1x128xf32, #tpu.memory_space<vmem>>, vector<1x128xf32>
    %11 = vector.broadcast %10 : vector<1x128xf32> to vector<16x128xf32>
    %12 = arith.addf %9, %11 : vector<16x128xf32>
    %13 = math.tanh %12 : vector<16x128xf32>
    %c0_10 = arith.constant 0 : index
    %c0_11 = arith.constant 0 : index
    %14 = vector.load %arg6[%c0_10, %c0_11] : memref<16x128xf32, #tpu.memory_space<vmem>>, vector<16x128xf32>
    tpu.vector_store %arg6[%c0_10, %c0_11], %13 {strides = array<i32>} : memref<16x128xf32, #tpu.memory_space<vmem>>, vector<16x128xf32>,
    return
  }
  func.func @transform_0(%arg0: i32) -> (i32, i32) {
    %c0_i32 = arith.constant 0 : i32
    %c0_i32_0 = arith.constant 0 : i32
    %c0_i32_1 = arith.constant 0 : i32
    return %c0_i32, %c0_i32_0 : i32, i32
  }
  func.func @transform_1(%arg0: i32) -> (i32, i32) {
    %c0_i32 = arith.constant 0 : i32
    %c0_i32_0 = arith.constant 0 : i32
    %c0_i32_1 = arith.constant 0 : i32
    return %c0_i32, %c0_i32_0 : i32, i32
  }
  func.func @transform_2(%arg0: i32) -> (i32, i32) {
    %c0_i32 = arith.constant 0 : i32
    %c0_i32_0 = arith.constant 0 : i32
    %c0_i32_1 = arith.constant 0 : i32
    return %c0_i32, %c0_i32_0 : i32, i32
  }
  func.func @transform_3(%arg0: i32) -> (i32, i32) {
    %c0_i32 = arith.constant 0 : i32
    %c0_i32_0 = arith.constant 0 : i32
    %c0_i32_1 = arith.constant 0 : i32
    return %c0_i32, %c0_i32_0 : i32, i32
  }
  func.func @transform_4(%arg0: i32) -> (i32, i32) {
    %c0_i32 = arith.constant 0 : i32
    %c0_i32_0 = arith.constant 0 : i32
    %c0_i32_1 = arith.constant 0 : i32
    return %c0_i32, %c0_i32_0 : i32, i32
  }
  func.func @transform_5(%arg0: i32) -> (i32, i32) {
    %c0_i32 = arith.constant 0 : i32
    %c0_i32_0 = arith.constant 0 : i32
    %c0_i32_1 = arith.constant 0 : i32
    return %c0_i32, %c0_i32_0 : i32, i32
  }
}

</mosaic_0001>

<bundles_post_ra>
// kernel: tpu_custom_call.1
= control target key start
LH: loop header
LB: loop body
LE: loop exit
PB: predicated region body
PF: predicated region fallthrough
CT: control target
= control target key end

     0   :  { %10 = vsyncpa [#allocation3], 0  ;;  %s4665_s0 = inlined_call_operand.hbm [shape: bf16[16,768], index: 0, kind: input, shape index: {}]   ;;  %s4666_s1 = inlined_call_operand.hbm [shape: bf16[768,1024], index: 1, kind: input, shape index: {}]   ;;  %s4667_s2 = inlined_call_operand.hbm [shape: f32[1,1024], index: 2, kind: input, shape index: {}]   ;;  %s4668_s3 = inlined_call_operand.hbm [shape: bf16[1024,128], index: 3, kind: input, shape index: {}]   ;;  %s4669_s4 = inlined_call_operand.hbm [shape: f32[1,128], index: 4, kind: input, shape index: {}]   ;;  %s4670_s5 = inlined_call_operand.hbm [shape: f32[16,128], index: 5, kind: output, shape index: {}]  }
   0x1   :  { %11 = vsyncpa [#allocation6], 0 }
   0x2   :  { %12 = vsyncpa [#allocation9], 0 }
   0x3   :  { %13 = vsyncpa [#allocation4], 0  ;;  %s4515_s18 = smov [#allocation5]  }
   0x4   :  { %s31_s19 = sshll.u32 %s4515_s18, 4  ;;  %s32_s19 = int_to_ptr.vmem [resolvable:$true] %s31_s19 }
   0x5   :  { %s4395_s20 = scalar_lea.vmem %s32_s19, 49152  ;;  %p4400_p1 = scmp.lt.s32.totalorder %s32_s19, %s32_s19 }
   0x6   :  { %p4396_p0 = scmp.ne.s32.totalorder %s32_s19, %s4395_s20  ;;  %p4401_p2 = scmp.lt.s32.totalorder %s4395_s20, %s4395_s20 }
   0x8   :  { %p4402_p3 = por %p4401_p2, %p4400_p1 }
   0xa   :  { %p4403_p4 = pnand %p4402_p3, %p4396_p0 }
   0xc   :  { %4406 = shalt.err (!%p4403_p4)
}
   0xd   :  { %s4516_s21 = smov 512   ;;  %s4517_s22 = smov 32  }
   0xe   :  { %37 = dma.hbm_to_vmem [thread:$0]  %s4666_s1, 49152, %s32_s19, [#allocation6], %s4516_s21, %s4516_s21, %s4517_s22  }
   0xf   :  { %s4518_s25 = smov [#allocation8]  }
  0x10   :  { %s53_s26 = sshll.u32 %s4518_s25, 4  ;;  %s54_s26 = int_to_ptr.vmem [resolvable:$true] %s53_s26 }
  0x11   :  { %s4415_s27 = scalar_lea.vmem %s54_s26, 8192  ;;  %p4420_p6 = scmp.lt.s32.totalorder %s54_s26, %s54_s26 }
  0x12   :  { %p4416_p5 = scmp.ne.s32.totalorder %s54_s26, %s4415_s27  ;;  %p4421_p7 = scmp.lt.s32.totalorder %s4415_s27, %s4415_s27 }
  0x14   :  { %p4422_p8 = por %p4421_p7, %p4420_p6 }
  0x16   :  { %p4423_p9 = pnand %p4422_p8, %p4416_p5 }
  0x18   :  { %4426 = shalt.err (!%p4423_p9)
}
  0x19   :  { %s4519_s28 = smov 64   ;;  %s4520_s29 = smov 4  }
  0x1a   :  { %59 = dma.hbm_to_vmem [thread:$0]  %s4668_s3, 8192, %s54_s26, [#allocation9], %s4519_s28, %s4519_s28, %s4520_s29  }
  0x1b   :  { %s4521_s7 = smov [#allocation2]  }
  0x1c   :  { %s19_s8 = sshll.u32 %s4521_s7, 4  ;;  %s20_s8 = int_to_ptr.vmem [resolvable:$true] %s19_s8 }
  0x1d   :  { %s4435_s1 = scalar_lea.vmem %s20_s8, 768  ;;  %p4440_p11 = scmp.lt.s32.totalorder %s20_s8, %s20_s8 }
  0x1e   :  { %p4436_p10 = scmp.ne.s32.totalorder %s20_s8, %s4435_s1  ;;  %p4441_p12 = scmp.lt.s32.totalorder %s4435_s1, %s4435_s1 }
  0x20   :  { %p4442_p13 = por %p4441_p12, %p4440_p11 }
  0x22   :  { %p4443_p0 = pnand %p4442_p13, %p4436_p10 }
  0x24   :  { %4446 = shalt.err (!%p4443_p0)
}
  0x25   :  { %s4522_s9 = smov 384   ;;  %s4523_s10 = smov 24  }
  0x26   :  { %25 = dma.hbm_to_vmem [thread:$0]  %s4665_s0, 768, %s20_s8, [#allocation3], %s4522_s9, %s4522_s9, %s4523_s10  }
  0x27   :  { %s4524_s13 = smov [#allocation7]   ;;  %s4525_s3 = smov [#allocation10]  }
  0x28   :  { %s44_s14 = sshll.u32 %s4524_s13, 4  ;;  %s66_s15 = sshll.u32 %s4525_s3, 4  ;;  %s45_s14 = int_to_ptr.vmem [resolvable:$true] %s44_s14  ;;  %s67_s15 = int_to_ptr.vmem [resolvable:$true] %s66_s15 }
  0x29   :  { %s4455_s16 = scalar_lea.vmem %s45_s14, 128  ;;  %p4460_p2 = scmp.lt.s32.totalorder %s45_s14, %s45_s14 }
  0x2a   :  { %p4456_p1 = scmp.ne.s32.totalorder %s45_s14, %s4455_s16  ;;  %p4461_p3 = scmp.lt.s32.totalorder %s4455_s16, %s4455_s16 }
  0x2c   :  { %p4462_p4 = por %p4461_p3, %p4460_p2 }
  0x2e   :  { %p4463_p5 = pnand %p4462_p4, %p4456_p1 }
  0x30   :  { %4466 = shalt.err (!%p4463_p5)
}
  0x31   :  { %47 = dma.hbm_to_vmem [thread:$0]  %s4667_s2, 128, %s45_s14, [#allocation6]  }
  0x32   :  { %s4475_s19 = scalar_lea.vmem %s67_s15, 16  ;;  %s4479_s0 = scalar_lea.vmem %s67_s15, 32 }
  0x33   :  { %p4476_p6 = scmp.ne.s32.totalorder %s67_s15, %s4475_s19  ;;  %p4480_p7 = scmp.lt.s32.totalorder %s67_s15, %s67_s15 }
  0x34   :  { %p4481_p8 = scmp.lt.s32.totalorder %s4479_s0, %s4475_s19 }
  0x36   :  { %p4482_p9 = por %p4481_p8, %p4480_p7 }
  0x38   :  { %p4483_p10 = pnand %p4482_p9, %p4476_p6 }
  0x3a   :  { %4486 = shalt.err (!%p4483_p10)
}
  0x3b   :  { %69 = dma.hbm_to_vmem [thread:$0]  %s4669_s4, 16, %s67_s15, [#allocation9]  }
  0x3c   :  { %4507 = dma.done.wait [#allocation3], 768  }
  0x3d   :  { %4508 = vsyncadd [#allocation3], 4294966528 }
  0x3e   :  { %4509 = dma.done.wait [#allocation6], 49280  }
  0x3f   :  { %4510 = vsyncadd [#allocation6], 4294918016 }
  0x40   :  { %4511 = dma.done.wait [#allocation9], 8208  }
  0x41   :  { %4512 = vsyncadd [#allocation9], 4294959088  ;;  %v148_v0 = vld [vmem:[#allocation5 + $0x1c0] sm:$0xff]  ;;  %v4574_v56 = vld [vmem:[#allocation2 + $0x4] ss:$24 sps:$4 sm:$0xff]   ;;  %s4526_s2 = smov [#allocation11]  }
  0x42   :  { %v152_v1 = vld [vmem:[#allocation5 + $0x1e0] sm:$0xff]  ;;  %v4576_v59 = vld [vmem:[#allocation2 + $0xc] ss:$24 sps:$4 sm:$0xff]   ;;  %2500 = vmatprep.mubr.bf16.mxu0 %v4574_v56  ;;  %s3700_s4 = sshll.u32 %s4526_s2, 4  ;;  %s3701_s4 = int_to_ptr.vmem [resolvable:$true] %s3700_s4 }
  0x43   :  { %v276_v2 = vld [vmem:[#allocation5 + $0x5c0] sm:$0xff]  ;;  %v3777_v3 = vcombine.high %v148_v0, %v152_v1  ;;  %v3776_v5 = vcombine.low %v148_v0, %v152_v1  ;;  %2543 = vmatprep.mubr.bf16.mxu1 %v4576_v59  ;;  %s4487_s22 = scalar_lea.vmem %s3701_s4, 256  ;;  %p4492_p12 = scmp.lt.s32.totalorder %s3701_s4, %s3701_s4 }
  0x44   :  { %v280_v4 = vld [vmem:[#allocation5 + $0x5e0] sm:$0xff]  ;;  %p4488_p11 = scmp.ne.s32.totalorder %s3701_s4, %s4487_s22  ;;  %p4493_p13 = scmp.lt.s32.totalorder %s4487_s22, %s4487_s22 }
  0x45   :  { %v140_v6 = vld [vmem:[#allocation5 + $0x180] sm:$0xff]  ;;  %v3905_v8 = vcombine.high %v276_v2, %v280_v4  ;;  %v3904_v9 = vcombine.low %v276_v2, %v280_v4  ;;  %2468 = vmatprep.subr.bf16.mxu0 %v3777_v3 }
  0x46   :  { %v144_v7 = vld [vmem:[#allocation5 + $0x1a0] sm:$0xff]  ;;  %2469 = vmatpush1.bf16.msra.mxu0 %v3776_v5  ;;  %p4494_p0 = por %p4493_p13, %p4492_p12 }
  0x47   :  { %v3769_v10 = vcombine.high %v140_v6, %v144_v7  ;;  %v268_v11 = vld [vmem:[#allocation5 + $0x580] sm:$0xff]  ;;  %2511 = vmatprep.subr.bf16.mxu1 %v3905_v8  ;;  %v3768_v18 = vcombine.low %v140_v6, %v144_v7 }
  0x48   :  { %v272_v12 = vld [vmem:[#allocation5 + $0x5a0] sm:$0xff]  ;;  %2512 = vmatpush1.bf16.msra.mxu1 %v3904_v9  ;;  %p4495_p1 = pnand %p4494_p0, %p4488_p11 }
  0x49   :  { %v132_v13 = vld [vmem:[#allocation5 + $0x140] sm:$0xff]  ;;  %v3897_v14 = vcombine.high %v268_v11, %v272_v12  ;;  %2470 = vmatprep.subr.bf16.mxu0 %v3769_v10  ;;  %v3896_v19 = vcombine.low %v268_v11, %v272_v12 }
  0x4a   :  { %v136_v15 = vld [vmem:[#allocation5 + $0x160] sm:$0xff]  ;;  %2471 = vmatpush1.bf16.msra.mxu0 %v3768_v18 }
  0x4b   :  { %v260_v16 = vld [vmem:[#allocation5 + $0x540] sm:$0xff]  ;;  %v3761_v20 = vcombine.high %v132_v13, %v136_v15  ;;  %2513 = vmatprep.subr.bf16.mxu1 %v3897_v14  ;;  %v3760_v26 = vcombine.low %v132_v13, %v136_v15 }
  0x4c   :  { %v264_v17 = vld [vmem:[#allocation5 + $0x560] sm:$0xff]  ;;  %2514 = vmatpush1.bf16.msra.mxu1 %v3896_v19 }
  0x4d   :  { %v3889_v21 = vcombine.high %v260_v16, %v264_v17  ;;  %v124_v22 = vld [vmem:[#allocation5 + $0x100] sm:$0xff]  ;;  %2472 = vmatprep.subr.bf16.mxu0 %v3761_v20  ;;  %v3888_v27 = vcombine.low %v260_v16, %v264_v17 }
  0x4e   :  { %v128_v23 = vld [vmem:[#allocation5 + $0x120] sm:$0xff]  ;;  %2473 = vmatpush1.bf16.msra.mxu0 %v3760_v26 }
  0x4f   :  { %v252_v24 = vld [vmem:[#allocation5 + $0x500] sm:$0xff]  ;;  %v3753_v28 = vcombine.high %v124_v22, %v128_v23  ;;  %2515 = vmatprep.subr.bf16.mxu1 %v3889_v21  ;;  %v3752_v34 = vcombine.low %v124_v22, %v128_v23 }
  0x50   :  { %v256_v25 = vld [vmem:[#allocation5 + $0x520] sm:$0xff]  ;;  %2516 = vmatpush1.bf16.msra.mxu1 %v3888_v27 }
  0x51   :  { %v3881_v29 = vcombine.high %v252_v24, %v256_v25  ;;  %v116_v30 = vld [vmem:[#allocation5 + $0xc0] sm:$0xff]  ;;  %2474 = vmatprep.subr.bf16.mxu0 %v3753_v28  ;;  %v3880_v35 = vcombine.low %v252_v24, %v256_v25 }
  0x52   :  { %v120_v31 = vld [vmem:[#allocation5 + $0xe0] sm:$0xff]  ;;  %2475 = vmatpush1.bf16.msra.mxu0 %v3752_v34 }
  0x53   :  { %v244_v32 = vld [vmem:[#allocation5 + $0x4c0] sm:$0xff]  ;;  %v3745_v36 = vcombine.high %v116_v30, %v120_v31  ;;  %2517 = vmatprep.subr.bf16.mxu1 %v3881_v29  ;;  %v3744_v42 = vcombine.low %v116_v30, %v120_v31 }
  0x54   :  { %v248_v33 = vld [vmem:[#allocation5 + $0x4e0] sm:$0xff]  ;;  %2518 = vmatpush1.bf16.msra.mxu1 %v3880_v35 }
  0x55   :  { %v3873_v37 = vcombine.high %v244_v32, %v248_v33  ;;  %v108_v38 = vld [vmem:[#allocation5 + $0x80] sm:$0xff]  ;;  %2476 = vmatprep.subr.bf16.mxu0 %v3745_v36  ;;  %v3872_v43 = vcombine.low %v244_v32, %v248_v33 }
  0x56   :  { %v112_v39 = vld [vmem:[#allocation5 + $0xa0] sm:$0xff]  ;;  %2477 = vmatpush1.bf16.msra.mxu0 %v3744_v42 }
  0x57   :  { %v236_v40 = vld [vmem:[#allocation5 + $0x480] sm:$0xff]  ;;  %v3737_v44 = vcombine.high %v108_v38, %v112_v39  ;;  %2519 = vmatprep.subr.bf16.mxu1 %v3873_v37  ;;  %v3736_v50 = vcombine.low %v108_v38, %v112_v39 }
  0x58   :  { %v240_v41 = vld [vmem:[#allocation5 + $0x4a0] sm:$0xff]  ;;  %2520 = vmatpush1.bf16.msra.mxu1 %v3872_v43 }
  0x59   :  { %v3865_v45 = vcombine.high %v236_v40, %v240_v41  ;;  %v100_v46 = vld [vmem:[#allocation5 + $0x40] sm:$0xff]  ;;  %2478 = vmatprep.subr.bf16.mxu0 %v3737_v44  ;;  %v3864_v52 = vcombine.low %v236_v40, %v240_v41 }
  0x5a   :  { %v104_v47 = vld [vmem:[#allocation5 + $0x60] sm:$0xff]  ;;  %2479 = vmatpush1.bf16.msra.mxu0 %v3736_v50 }
  0x5b   :  { %v228_v48 = vld [vmem:[#allocation5 + $0x440] sm:$0xff]  ;;  %v3729_v53 = vcombine.high %v100_v46, %v104_v47  ;;  %2521 = vmatprep.subr.bf16.mxu1 %v3865_v45  ;;  %v3728_v60 = vcombine.low %v100_v46, %v104_v47 }
  0x5c   :  { %v232_v49 = vld [vmem:[#allocation5 + $0x460] sm:$0xff]  ;;  %2522 = vmatpush1.bf16.msra.mxu1 %v3864_v52 }
  0x5d   :  { %v92_v51 = vld [vmem:[#allocation5] sm:$0xff]  ;;  %v3857_v55 = vcombine.high %v228_v48, %v232_v49  ;;  %2480 = vmatprep.subr.bf16.mxu0 %v3729_v53  ;;  %v3856_v61 = vcombine.low %v228_v48, %v232_v49 }
  0x5e   :  { %v96_v54 = vld [vmem:[#allocation5 + $0x20] sm:$0xff]  ;;  %2481 = vmatpush1.bf16.msra.mxu0 %v3728_v60 }
  0x5f   :  { %v220_v57 = vld [vmem:[#allocation5 + $0x400] sm:$0xff]  ;;  %v3721_v62 = vcombine.high %v92_v51, %v96_v54  ;;  %2523 = vmatprep.subr.bf16.mxu1 %v3857_v55  ;;  %v3720_v4 = vcombine.low %v92_v51, %v96_v54 }
  0x60   :  { %v224_v58 = vld [vmem:[#allocation5 + $0x420] sm:$0xff]  ;;  %2524 = vmatpush1.bf16.msra.mxu1 %v3856_v61 }
  0x61   :  { %v3849_v63 = vcombine.high %v220_v57, %v224_v58  ;;  %v212_v0 = vld [vmem:[#allocation5 + $0x3c0] sm:$0xff]  ;;  %2482 = vmatprep.subr.bf16.mxu0 %v3721_v62  ;;  %v3848_v5 = vcombine.low %v220_v57, %v224_v58 }
  0x62   :  { %v216_v1 = vld [vmem:[#allocation5 + $0x3e0] sm:$0xff]  ;;  %2483 = vmatpush1.bf16.msra.mxu0 %v3720_v4  ;;  %v149_v4 = vld [vmem:[#allocation5 + $0x1c8] sm:$0xff] }
  0x63   :  { %v340_v2 = vld [vmem:[#allocation5 + $0x7c0] sm:$0xff]  ;;  %v3841_v6 = vcombine.high %v212_v0, %v216_v1  ;;  %2525 = vmatprep.subr.bf16.mxu1 %v3849_v63  ;;  %v3840_v12 = vcombine.low %v212_v0, %v216_v1 }
  0x64   :  { %v344_v3 = vld [vmem:[#allocation5 + $0x7e0] sm:$0xff]  ;;  %2526 = vmatpush1.bf16.msra.mxu1 %v3848_v5  ;;  %v153_v5 = vld [vmem:[#allocation5 + $0x1e8] sm:$0xff] }
  0x65   :  { %v3969_v7 = vcombine.high %v340_v2, %v344_v3  ;;  %v204_v8 = vld [vmem:[#allocation5 + $0x380] sm:$0xff]  ;;  %2484 = vmatprep.subr.bf16.mxu0 %v3841_v6  ;;  %v3968_v13 = vcombine.low %v340_v2, %v344_v3 }
  0x66   :  { %v208_v9 = vld [vmem:[#allocation5 + $0x3a0] sm:$0xff]  ;;  %2485 = vmatpush2.bf16.msra.mxu0 %v3840_v12  ;;  %v4580_v12 = vld [vmem:[#allocation2] ss:$24 sps:$4 sm:$0xff]  }
  0x67   :  { %v332_v10 = vld [vmem:[#allocation5 + $0x780] sm:$0xff]  ;;  %v3833_v14 = vcombine.high %v204_v8, %v208_v9  ;;  %2527 = vmatprep.subr.bf16.mxu1 %v3969_v7  ;;  %v3832_v20 = vcombine.low %v204_v8, %v208_v9  ;;  %v3779_v9 = vcombine.high %v149_v4, %v153_v5 }
  0x68   :  { %v336_v11 = vld [vmem:[#allocation5 + $0x7a0] sm:$0xff]  ;;  %2528 = vmatpush2.bf16.msra.mxu1 %v3968_v13  ;;  %v141_v13 = vld [vmem:[#allocation5 + $0x188] sm:$0xff] }
  0x69   :  { %v3961_v15 = vcombine.high %v332_v10, %v336_v11  ;;  %v196_v16 = vld [vmem:[#allocation5 + $0x340] sm:$0xff]  ;;  %2486 = vmatprep.subr.bf16.mxu0 %v3833_v14  ;;  %v3960_v21 = vcombine.low %v332_v10, %v336_v11  ;;  %v145_v14 = vld [vmem:[#allocation5 + $0x1a8] sm:$0xff] }
  0x6a   :  { %v200_v17 = vld [vmem:[#allocation5 + $0x360] sm:$0xff]  ;;  %2487 = vmatpush2.bf16.msra.mxu0 %v3832_v20 }
  0x6b   :  { %v324_v18 = vld [vmem:[#allocation5 + $0x740] sm:$0xff]  ;;  %v3825_v22 = vcombine.high %v196_v16, %v200_v17  ;;  %2529 = vmatprep.subr.bf16.mxu1 %v3961_v15  ;;  %v3824_v28 = vcombine.low %v196_v16, %v200_v17  ;;  %v4276_v15 = vld [vmem:[#allocation2 + $0x8] ss:$24 sps:$4 sm:$0xff]   ;;  %v3778_v17 = vcombine.low %v149_v4, %v153_v5 }
  0x6c   :  { %v328_v19 = vld [vmem:[#allocation5 + $0x760] sm:$0xff]  ;;  %2530 = vmatpush2.bf16.msra.mxu1 %v3960_v21 }
  0x6d   :  { %v3953_v23 = vcombine.high %v324_v18, %v328_v19  ;;  %v188_v24 = vld [vmem:[#allocation5 + $0x300] sm:$0xff]  ;;  %2488 = vmatprep.subr.bf16.mxu0 %v3825_v22  ;;  %v3952_v29 = vcombine.low %v324_v18, %v328_v19  ;;  %v3771_v19 = vcombine.high %v141_v13, %v145_v14 }
  0x6e   :  { %v192_v25 = vld [vmem:[#allocation5 + $0x320] sm:$0xff]  ;;  %2489 = vmatpush2.bf16.msra.mxu0 %v3824_v28 }
  0x6f   :  { %v316_v26 = vld [vmem:[#allocation5 + $0x700] sm:$0xff]  ;;  %v3817_v30 = vcombine.high %v188_v24, %v192_v25  ;;  %2531 = vmatprep.subr.bf16.mxu1 %v3953_v23  ;;  %v3816_v36 = vcombine.low %v188_v24, %v192_v25  ;;  %v133_v23 = vld [vmem:[#allocation5 + $0x148] sm:$0xff] }
  0x70   :  { %v320_v27 = vld [vmem:[#allocation5 + $0x720] sm:$0xff]  ;;  %2532 = vmatpush2.bf16.msra.mxu1 %v3952_v29  ;;  %v137_v24 = vld [vmem:[#allocation5 + $0x168] sm:$0xff] }
  0x71   :  { %v3945_v31 = vcombine.high %v316_v26, %v320_v27  ;;  %v180_v32 = vld [vmem:[#allocation5 + $0x2c0] sm:$0xff]  ;;  %2490 = vmatprep.subr.bf16.mxu0 %v3817_v30  ;;  %v3944_v37 = vcombine.low %v316_v26, %v320_v27  ;;  %v3770_v26 = vcombine.low %v141_v13, %v145_v14  ;;  %v3763_v30 = vcombine.high %v133_v23, %v137_v24 }
  0x72   :  { %v184_v33 = vld [vmem:[#allocation5 + $0x2e0] sm:$0xff]  ;;  %2491 = vmatpush2.bf16.msra.mxu0 %v3816_v36 }
  0x73   :  { %v308_v34 = vld [vmem:[#allocation5 + $0x6c0] sm:$0xff]  ;;  %v3809_v38 = vcombine.high %v180_v32, %v184_v33  ;;  %2533 = vmatprep.subr.bf16.mxu1 %v3945_v31  ;;  %v3808_v44 = vcombine.low %v180_v32, %v184_v33  ;;  %v125_v31 = vld [vmem:[#allocation5 + $0x108] sm:$0xff] }
  0x74   :  { %v312_v35 = vld [vmem:[#allocation5 + $0x6e0] sm:$0xff]  ;;  %2534 = vmatpush2.bf16.msra.mxu1 %v3944_v37  ;;  %v129_v32 = vld [vmem:[#allocation5 + $0x128] sm:$0xff] }
  0x75   :  { %v3937_v39 = vcombine.high %v308_v34, %v312_v35  ;;  %v172_v40 = vld [vmem:[#allocation5 + $0x280] sm:$0xff]  ;;  %2492 = vmatprep.subr.bf16.mxu0 %v3809_v38  ;;  %v3936_v45 = vcombine.low %v308_v34, %v312_v35  ;;  %v3762_v34 = vcombine.low %v133_v23, %v137_v24  ;;  %v117_v38 = vld [vmem:[#allocation5 + $0xc8] sm:$0xff] }
  0x76   :  { %v176_v41 = vld [vmem:[#allocation5 + $0x2a0] sm:$0xff]  ;;  %2493 = vmatpush2.bf16.msra.mxu0 %v3808_v44 }
  0x77   :  { %v300_v42 = vld [vmem:[#allocation5 + $0x680] sm:$0xff]  ;;  %v3801_v46 = vcombine.high %v172_v40, %v176_v41  ;;  %2535 = vmatprep.subr.bf16.mxu1 %v3937_v39  ;;  %v3800_v52 = vcombine.low %v172_v40, %v176_v41  ;;  %v3755_v39 = vcombine.high %v125_v31, %v129_v32  ;;  %v121_v40 = vld [vmem:[#allocation5 + $0xe8] sm:$0xff] }
  0x78   :  { %v304_v43 = vld [vmem:[#allocation5 + $0x6a0] sm:$0xff]  ;;  %2536 = vmatpush2.bf16.msra.mxu1 %v3936_v45  ;;  %v109_v45 = vld [vmem:[#allocation5 + $0x88] sm:$0xff] }
  0x79   :  { %v3929_v47 = vcombine.high %v300_v42, %v304_v43  ;;  %v164_v48 = vld [vmem:[#allocation5 + $0x240] sm:$0xff]  ;;  %2494 = vmatprep.subr.bf16.mxu0 %v3801_v46  ;;  %v3928_v53 = vcombine.low %v300_v42, %v304_v43  ;;  %v3754_v42 = vcombine.low %v125_v31, %v129_v32  ;;  %v3747_v46 = vcombine.high %v117_v38, %v121_v40 }
  0x7a   :  { %v168_v49 = vld [vmem:[#allocation5 + $0x260] sm:$0xff]  ;;  %2495 = vmatpush2.bf16.msra.mxu0 %v3800_v52 }
  0x7b   :  { %v292_v50 = vld [vmem:[#allocation5 + $0x640] sm:$0xff]  ;;  %v3793_v54 = vcombine.high %v164_v48, %v168_v49  ;;  %2537 = vmatprep.subr.bf16.mxu1 %v3929_v47  ;;  %v3792_v62 = vcombine.low %v164_v48, %v168_v49  ;;  %v113_v47 = vld [vmem:[#allocation5 + $0xa8] sm:$0xff]  ;;  %v3746_v49 = vcombine.low %v117_v38, %v121_v40 }
  0x7c   :  { %v296_v51 = vld [vmem:[#allocation5 + $0x660] sm:$0xff]  ;;  %2538 = vmatpush2.bf16.msra.mxu1 %v3928_v53  ;;  %v101_v53 = vld [vmem:[#allocation5 + $0x48] sm:$0xff] }
  0x7d   :  { %v3921_v55 = vcombine.high %v292_v50, %v296_v51  ;;  %v156_v57 = vld [vmem:[#allocation5 + $0x200] sm:$0xff]  ;;  %2496 = vmatprep.subr.bf16.mxu0 %v3793_v54  ;;  %v3920_v63 = vcombine.low %v292_v50, %v296_v51  ;;  %v3739_v54 = vcombine.high %v109_v45, %v113_v47 }
  0x7e   :  { %v160_v58 = vld [vmem:[#allocation5 + $0x220] sm:$0xff]  ;;  %2497 = vmatpush2.bf16.msra.mxu0 %v3792_v62 }
  0x7f   :  { %v284_v60 = vld [vmem:[#allocation5 + $0x600] sm:$0xff]  ;;  %v3785_v0 = vcombine.high %v156_v57, %v160_v58  ;;  %2539 = vmatprep.subr.bf16.mxu1 %v3921_v55  ;;  %v3784_v6 = vcombine.low %v156_v57, %v160_v58  ;;  %v105_v55 = vld [vmem:[#allocation5 + $0x68] sm:$0xff]  ;;  %v3738_v58 = vcombine.low %v109_v45, %v113_v47 }
  0x80   :  { %v288_v61 = vld [vmem:[#allocation5 + $0x620] sm:$0xff]  ;;  %2540 = vmatpush2.bf16.msra.mxu1 %v3920_v63  ;;  %v93_v63 = vld [vmem:[#allocation5 + $0x8] sm:$0xff] }
  0x81   :  { %v3913_v1 = vcombine.high %v284_v60, %v288_v61  ;;  %v404_v2 = vld [vmem:[#allocation5 + $0x9c0] sm:$0xff]  ;;  %2498 = vmatprep.subr.bf16.mxu0 %v3785_v0  ;;  %v3912_v7 = vcombine.low %v284_v60, %v288_v61  ;;  %v3731_v0 = vcombine.high %v101_v53, %v105_v55 }
  0x82   :  { %v408_v3 = vld [vmem:[#allocation5 + $0x9e0] sm:$0xff]  ;;  %2499 = vmatpush2.bf16.msra.mxu0 %v3784_v6 }
  0x83   :  { %v4033_v8 = vcombine.high %v404_v2, %v408_v3  ;;  %2541 = vmatprep.subr.bf16.mxu1 %v3913_v1  ;;  %v396_v10 = vld [vmem:[#allocation5 + $0x980] sm:$0xff]  ;;  %v4032_v16 = vcombine.low %v404_v2, %v408_v3  ;;  %v97_v1 = vld [vmem:[#allocation5 + $0x28] sm:$0xff]  ;;  %v3730_v3 = vcombine.low %v101_v53, %v105_v55 }
  0x84   :  { %v400_v11 = vld [vmem:[#allocation5 + $0x9a0] sm:$0xff]  ;;  %2542 = vmatpush2.bf16.msra.mxu1 %v3912_v7  ;;  %v213_v7 = vld [vmem:[#allocation5 + $0x3c8] sm:$0xff] }
  0x85   :  { %2554 = vmatprep.subr.bf16.mxu0 %v4033_v8  ;;  %v4025_v18 = vcombine.high %v396_v10, %v400_v11  ;;  %2597 = vmatprep.subr.bf16.mxu1 %v3779_v9  ;;  %v388_v20 = vld [vmem:[#allocation5 + $0x940] sm:$0xff]  ;;  %v4024_v25 = vcombine.low %v396_v10, %v400_v11  ;;  %v3723_v8 = vcombine.high %v93_v63, %v97_v1  ;;  %v217_v9 = vld [vmem:[#allocation5 + $0x3e8] sm:$0xff] }
  0x86   :  { %v392_v21 = vld [vmem:[#allocation5 + $0x960] sm:$0xff]  ;;  %2501 = vmatmul.mubr.bf16.vlgmr.msra.gmra.mxu0 %v4580_v12  ;;  %v3722_v11 = vcombine.low %v93_v63, %v97_v1 }
  0x87   :  { %v4582_v22 = vld [vmem:[#allocation2 + $0x14] ss:$24 sps:$4 sm:$0xff]   ;;  %2544 = vmatmul.mubr.bf16.vlgmr.msra.gmra.mxu1 %v4276_v15  ;;  %2555 = vmatpush1.bf16.msra.mxu0 %v4032_v16  ;;  %v4017_v27 = vcombine.high %v388_v20, %v392_v21  ;;  %v4016_v33 = vcombine.low %v388_v20, %v392_v21  ;;  %v205_v16 = vld [vmem:[#allocation5 + $0x388] sm:$0xff]  ;;  %v3842_v20 = vcombine.low %v213_v7, %v217_v9 }
  0x88   :  { %2598 = vmatpush1.bf16.msra.mxu1 %v3778_v17  ;;  %2556 = vmatprep.subr.bf16.mxu0 %v4025_v18  ;;  %v380_v28 = vld [vmem:[#allocation5 + $0x900] sm:$0xff]  ;;  %v3843_v17 = vcombine.high %v213_v7, %v217_v9  ;;  %v209_v18 = vld [vmem:[#allocation5 + $0x3a8] sm:$0xff] }
  0x89   :  { %v384_v29 = vld [vmem:[#allocation5 + $0x920] sm:$0xff]  ;;  %2599 = vmatprep.subr.bf16.mxu1 %v3771_v19  ;;  %2586 = vmatprep.mubr.bf16.mxu0 %v4582_v22  ;;  %v281_v9 = vld [vmem:[#allocation5 + $0x5e8] sm:$0xff] }
  0x8a   :  { %2629 = vmatprep.mubr.bf16.mxu1 %v4574_v56  ;;  %v4009_v35 = vcombine.high %v380_v28, %v384_v29  ;;  %v372_v36 = vld [vmem:[#allocation5 + $0x8c0] sm:$0xff]  ;;  %v4008_v41 = vcombine.low %v380_v28, %v384_v29  ;;  %v3834_v29 = vcombine.low %v205_v16, %v209_v18 }
  0x8b   :  { %2557 = vmatpush1.bf16.msra.mxu0 %v4024_v25  ;;  %v376_v37 = vld [vmem:[#allocation5 + $0x8e0] sm:$0xff]  ;;  %v197_v25 = vld [vmem:[#allocation5 + $0x348] sm:$0xff] }
  0x8c   :  { %2600 = vmatpush1.bf16.msra.mxu1 %v3770_v26  ;;  %2558 = vmatprep.subr.bf16.mxu0 %v4017_v27  ;;  %v4001_v43 = vcombine.high %v372_v36, %v376_v37  ;;  %v364_v44 = vld [vmem:[#allocation5 + $0x880] sm:$0xff]  ;;  %v4000_v48 = vcombine.low %v372_v36, %v376_v37  ;;  %v3835_v26 = vcombine.high %v205_v16, %v209_v18  ;;  %v201_v27 = vld [vmem:[#allocation5 + $0x368] sm:$0xff] }
  0x8d   :  { %2601 = vmatprep.subr.bf16.mxu1 %v3763_v30  ;;  %v368_v56 = vld [vmem:[#allocation5 + $0x8a0] sm:$0xff]  ;;  %v3826_v37 = vcombine.low %v197_v25, %v201_v27  ;;  %v269_v18 = vld [vmem:[#allocation5 + $0x588] sm:$0xff] }
  0x8e   :  { %v3993_v50 = vcombine.high %v364_v44, %v368_v56  ;;  %v356_v51 = vld [vmem:[#allocation5 + $0x840] sm:$0xff]  ;;  %v3992_v57 = vcombine.low %v364_v44, %v368_v56 }
  0x8f   :  { %2559 = vmatpush1.bf16.msra.mxu0 %v4016_v33  ;;  %v360_v52 = vld [vmem:[#allocation5 + $0x860] sm:$0xff]  ;;  %v189_v33 = vld [vmem:[#allocation5 + $0x308] sm:$0xff] }
  0x90   :  { %2602 = vmatpush1.bf16.msra.mxu1 %v3762_v34  ;;  %2560 = vmatprep.subr.bf16.mxu0 %v4009_v35  ;;  %v3985_v60 = vcombine.high %v356_v51, %v360_v52  ;;  %v348_v61 = vld [vmem:[#allocation5 + $0x800] sm:$0xff]  ;;  %v3984_v2 = vcombine.low %v356_v51, %v360_v52  ;;  %v3827_v34 = vcombine.high %v197_v25, %v201_v27  ;;  %v193_v35 = vld [vmem:[#allocation5 + $0x328] sm:$0xff] }
  0x91   :  { %2603 = vmatprep.subr.bf16.mxu1 %v3755_v39  ;;  %v352_v62 = vld [vmem:[#allocation5 + $0x820] sm:$0xff]  ;;  %v3818_v56 = vcombine.low %v189_v33, %v193_v35  ;;  %v261_v27 = vld [vmem:[#allocation5 + $0x548] sm:$0xff] }
  0x92   :  { %v3977_v4 = vcombine.high %v348_v61, %v352_v62  ;;  %v468_v5 = vld [vmem:[#allocation5 + $0xbc0] sm:$0xff]  ;;  %v3976_v10 = vcombine.low %v348_v61, %v352_v62 }
  0x93   :  { %2561 = vmatpush1.bf16.msra.mxu0 %v4008_v41  ;;  %v472_v6 = vld [vmem:[#allocation5 + $0xbe0] sm:$0xff]  ;;  %v181_v41 = vld [vmem:[#allocation5 + $0x2c8] sm:$0xff] }
  0x94   :  { %2604 = vmatpush1.bf16.msra.mxu1 %v3754_v42  ;;  %2562 = vmatprep.subr.bf16.mxu0 %v4001_v43  ;;  %v4097_v13 = vcombine.high %v468_v5, %v472_v6  ;;  %v460_v14 = vld [vmem:[#allocation5 + $0xb80] sm:$0xff]  ;;  %v4096_v19 = vcombine.low %v468_v5, %v472_v6  ;;  %v3819_v42 = vcombine.high %v189_v33, %v193_v35  ;;  %v185_v43 = vld [vmem:[#allocation5 + $0x2e8] sm:$0xff] }
  0x95   :  { %2605 = vmatprep.subr.bf16.mxu1 %v3747_v46  ;;  %v464_v15 = vld [vmem:[#allocation5 + $0xba0] sm:$0xff]  ;;  %v3810_v52 = vcombine.low %v181_v41, %v185_v43  ;;  %v253_v35 = vld [vmem:[#allocation5 + $0x508] sm:$0xff] }
  0x96   :  { %v4089_v21 = vcombine.high %v460_v14, %v464_v15  ;;  %v452_v23 = vld [vmem:[#allocation5 + $0xb40] sm:$0xff]  ;;  %v4088_v28 = vcombine.low %v460_v14, %v464_v15 }
  0x97   :  { %2563 = vmatpush1.bf16.msra.mxu0 %v4000_v48  ;;  %v456_v24 = vld [vmem:[#allocation5 + $0xb60] sm:$0xff]  ;;  %v173_v48 = vld [vmem:[#allocation5 + $0x288] sm:$0xff] }
  0x98   :  { %2606 = vmatpush1.bf16.msra.mxu1 %v3746_v49  ;;  %2564 = vmatprep.subr.bf16.mxu0 %v3993_v50  ;;  %v4081_v30 = vcombine.high %v452_v23, %v456_v24  ;;  %v444_v31 = vld [vmem:[#allocation5 + $0xb00] sm:$0xff]  ;;  %v4080_v36 = vcombine.low %v452_v23, %v456_v24  ;;  %v3811_v49 = vcombine.high %v181_v41, %v185_v43  ;;  %v177_v50 = vld [vmem:[#allocation5 + $0x2a8] sm:$0xff] }
  0x99   :  { %2607 = vmatprep.subr.bf16.mxu1 %v3739_v54  ;;  %v448_v32 = vld [vmem:[#allocation5 + $0xb20] sm:$0xff]  ;;  %v3802_v62 = vcombine.low %v173_v48, %v177_v50  ;;  %v401_v23 = vld [vmem:[#allocation5 + $0x9a8] sm:$0xff] }
  0x9a   :  { %v4073_v38 = vcombine.high %v444_v31, %v448_v32  ;;  %v436_v39 = vld [vmem:[#allocation5 + $0xac0] sm:$0xff]  ;;  %v4072_v44 = vcombine.low %v444_v31, %v448_v32  ;;  %v393_v31 = vld [vmem:[#allocation5 + $0x968] sm:$0xff] }
  0x9b   :  { %2565 = vmatpush1.bf16.msra.mxu0 %v3992_v57  ;;  %v440_v40 = vld [vmem:[#allocation5 + $0xae0] sm:$0xff]  ;;  %v165_v57 = vld [vmem:[#allocation5 + $0x248] sm:$0xff] }
  0x9c   :  { %2608 = vmatpush1.bf16.msra.mxu1 %v3738_v58  ;;  %2566 = vmatprep.subr.bf16.mxu0 %v3985_v60  ;;  %v4065_v45 = vcombine.high %v436_v39, %v440_v40  ;;  %v428_v46 = vld [vmem:[#allocation5 + $0xa80] sm:$0xff]  ;;  %v4064_v51 = vcombine.low %v436_v39, %v440_v40  ;;  %v3803_v58 = vcombine.high %v173_v48, %v177_v50  ;;  %v169_v60 = vld [vmem:[#allocation5 + $0x268] sm:$0xff] }
  0x9d   :  { %2609 = vmatprep.subr.bf16.mxu1 %v3731_v0  ;;  %v432_v47 = vld [vmem:[#allocation5 + $0xaa0] sm:$0xff]  ;;  %v3794_v6 = vcombine.low %v165_v57, %v169_v60  ;;  %v385_v39 = vld [vmem:[#allocation5 + $0x928] sm:$0xff] }
  0x9e   :  { %v4057_v53 = vcombine.high %v428_v46, %v432_v47  ;;  %v420_v54 = vld [vmem:[#allocation5 + $0xa40] sm:$0xff]  ;;  %v4056_v61 = vcombine.low %v428_v46, %v432_v47  ;;  %v245_v43 = vld [vmem:[#allocation5 + $0x4c8] sm:$0xff] }
  0x9f   :  { %2567 = vmatpush1.bf16.msra.mxu0 %v3984_v2  ;;  %v424_v55 = vld [vmem:[#allocation5 + $0xa60] sm:$0xff]  ;;  %v157_v2 = vld [vmem:[#allocation5 + $0x208] sm:$0xff] }
  0xa0   :  { %2610 = vmatpush1.bf16.msra.mxu1 %v3730_v3  ;;  %2568 = vmatprep.subr.bf16.mxu0 %v3977_v4  ;;  %v4049_v63 = vcombine.high %v420_v54, %v424_v55  ;;  %v412_v0 = vld [vmem:[#allocation5 + $0xa00] sm:$0xff]  ;;  %v3795_v3 = vcombine.high %v165_v57, %v169_v60  ;;  %v161_v4 = vld [vmem:[#allocation5 + $0x228] sm:$0xff]  ;;  %v4048_v5 = vcombine.low %v420_v54, %v424_v55 }
  0xa1   :  { %2611 = vmatprep.subr.bf16.mxu1 %v3723_v8  ;;  %v416_v1 = vld [vmem:[#allocation5 + $0xa20] sm:$0xff]  ;;  %v277_v8 = vld [vmem:[#allocation5 + $0x5c8] sm:$0xff]  ;;  %v3786_v15 = vcombine.low %v157_v2, %v161_v4 }
  0xa2   :  { %v4041_v7 = vcombine.high %v412_v0, %v416_v1  ;;  %v4040_v14 = vcombine.low %v412_v0, %v416_v1  ;;  %v4587_v16 = vld [vmem:[#allocation2 + $0x10] ss:$24 sps:$4 sm:$0xff]   ;;  %v3906_v24 = vcombine.low %v277_v8, %v281_v9  ;;  %v237_v48 = vld [vmem:[#allocation5 + $0x488] sm:$0xff] }
  0xa3   :  { %2569 = vmatpush1.bf16.msra.mxu0 %v3976_v10  ;;  %v405_v10 = vld [vmem:[#allocation5 + $0x9c8] sm:$0xff] }
  0xa4   :  { %2612 = vmatpush1.bf16.msra.mxu1 %v3722_v11  ;;  %2570 = vmatprep.subr.bf16.mxu0 %v4097_v13  ;;  %v3787_v11 = vcombine.high %v157_v2, %v161_v4  ;;  %v409_v13 = vld [vmem:[#allocation5 + $0x9e8] sm:$0xff] }
  0xa5   :  { %2613 = vmatprep.subr.bf16.mxu1 %v3843_v17  ;;  %v3907_v17 = vcombine.high %v277_v8, %v281_v9  ;;  %v4034_v25 = vcombine.low %v405_v10, %v409_v13  ;;  %v365_v50 = vld [vmem:[#allocation5 + $0x888] sm:$0xff] }
  0xa6   :  { %v229_v57 = vld [vmem:[#allocation5 + $0x448] sm:$0xff] }
  0xa7   :  { %2571 = vmatpush2.bf16.msra.mxu0 %v4096_v19  ;;  %v273_v19 = vld [vmem:[#allocation5 + $0x5a8] sm:$0xff] }
  0xa8   :  { %2614 = vmatpush2.bf16.msra.mxu1 %v3842_v20  ;;  %2572 = vmatprep.subr.bf16.mxu0 %v4089_v21  ;;  %v397_v20 = vld [vmem:[#allocation5 + $0x988] sm:$0xff]  ;;  %v4035_v21 = vcombine.high %v405_v10, %v409_v13  ;;  %v3898_v32 = vcombine.low %v269_v18, %v273_v19 }
  0xa9   :  { %2615 = vmatprep.subr.bf16.mxu1 %v3835_v26  ;;  %v3899_v26 = vcombine.high %v269_v18, %v273_v19  ;;  %v4026_v33 = vcombine.low %v397_v20, %v401_v23  ;;  %v357_v60 = vld [vmem:[#allocation5 + $0x848] sm:$0xff] }
  0xaa   :  { %v221_v2 = vld [vmem:[#allocation5 + $0x408] sm:$0xff] }
  0xab   :  { %2573 = vmatpush2.bf16.msra.mxu0 %v4088_v28  ;;  %v4027_v28 = vcombine.high %v397_v20, %v401_v23  ;;  %v349_v4 = vld [vmem:[#allocation5 + $0x808] sm:$0xff] }
  0xac   :  { %2616 = vmatpush2.bf16.msra.mxu1 %v3834_v29  ;;  %2574 = vmatprep.subr.bf16.mxu0 %v4081_v30  ;;  %v265_v29 = vld [vmem:[#allocation5 + $0x568] sm:$0xff] }
  0xad   :  { %2617 = vmatprep.subr.bf16.mxu1 %v3827_v34  ;;  %v389_v30 = vld [vmem:[#allocation5 + $0x948] sm:$0xff]  ;;  %v3891_v34 = vcombine.high %v261_v27, %v265_v29  ;;  %v3890_v40 = vcombine.low %v261_v27, %v265_v29 }
  0xae   :  { %v341_v10 = vld [vmem:[#allocation5 + $0x7c8] sm:$0xff] }
  0xaf   :  { %2575 = vmatpush2.bf16.msra.mxu0 %v4080_v36  ;;  %v257_v36 = vld [vmem:[#allocation5 + $0x528] sm:$0xff] }
  0xb0   :  { %2618 = vmatpush2.bf16.msra.mxu1 %v3826_v37  ;;  %2576 = vmatprep.subr.bf16.mxu0 %v4073_v38  ;;  %v4019_v37 = vcombine.high %v389_v30, %v393_v31  ;;  %v381_v38 = vld [vmem:[#allocation5 + $0x908] sm:$0xff]  ;;  %v3883_v41 = vcombine.high %v253_v35, %v257_v36  ;;  %v3882_v46 = vcombine.low %v253_v35, %v257_v36 }
  0xb1   :  { %2619 = vmatprep.subr.bf16.mxu1 %v3819_v42  ;;  %v4011_v42 = vcombine.high %v381_v38, %v385_v39  ;;  %v469_v13 = vld [vmem:[#allocation5 + $0xbc8] sm:$0xff] }
  0xb2   :  { %v333_v20 = vld [vmem:[#allocation5 + $0x788] sm:$0xff] }
  0xb3   :  { %2577 = vmatpush2.bf16.msra.mxu0 %v4072_v44  ;;  %v249_v44 = vld [vmem:[#allocation5 + $0x4e8] sm:$0xff] }
  0xb4   :  { %2620 = vmatpush2.bf16.msra.mxu1 %v3818_v56  ;;  %2578 = vmatprep.subr.bf16.mxu0 %v4065_v45  ;;  %v373_v56 = vld [vmem:[#allocation5 + $0x8c8] sm:$0xff]  ;;  %v3875_v47 = vcombine.high %v245_v43, %v249_v44 }
  0xb5   :  { %2621 = vmatprep.subr.bf16.mxu1 %v3811_v49  ;;  %v377_v45 = vld [vmem:[#allocation5 + $0x8e8] sm:$0xff] }
  0xb6   :  { %v241_v49 = vld [vmem:[#allocation5 + $0x4a8] sm:$0xff] }
  0xb7   :  { %2579 = vmatpush2.bf16.msra.mxu0 %v4064_v51  ;;  %v369_v51 = vld [vmem:[#allocation5 + $0x8a8] sm:$0xff]  ;;  %v3867_v54 = vcombine.high %v237_v48, %v241_v49 }
  0xb8   :  { %2622 = vmatpush2.bf16.msra.mxu1 %v3810_v52  ;;  %2580 = vmatprep.subr.bf16.mxu0 %v4057_v53  ;;  %v3874_v52 = vcombine.low %v245_v43, %v249_v44  ;;  %v4002_v53 = vcombine.low %v373_v56, %v377_v45  ;;  %v3995_v55 = vcombine.high %v365_v50, %v369_v51  ;;  %v461_v23 = vld [vmem:[#allocation5 + $0xb88] sm:$0xff] }
  0xb9   :  { %2623 = vmatprep.subr.bf16.mxu1 %v3803_v58  ;;  %v233_v58 = vld [vmem:[#allocation5 + $0x468] sm:$0xff] }
  0xba   :  { %v3859_v0 = vcombine.high %v229_v57, %v233_v58  ;;  %v325_v29 = vld [vmem:[#allocation5 + $0x748] sm:$0xff] }
  0xbb   :  { %2581 = vmatpush2.bf16.msra.mxu0 %v4056_v61  ;;  %v361_v61 = vld [vmem:[#allocation5 + $0x868] sm:$0xff] }
  0xbc   :  { %2624 = vmatpush2.bf16.msra.mxu1 %v3802_v62  ;;  %2582 = vmatprep.subr.bf16.mxu0 %v4049_v63  ;;  %v3866_v62 = vcombine.low %v237_v48, %v241_v49  ;;  %v3994_v63 = vcombine.low %v365_v50, %v369_v51  ;;  %v3987_v1 = vcombine.high %v357_v60, %v361_v61  ;;  %v309_v44 = vld [vmem:[#allocation5 + $0x6c8] sm:$0xff] }
  0xbd   :  { %2625 = vmatprep.subr.bf16.mxu1 %v3795_v3  ;;  %v225_v3 = vld [vmem:[#allocation5 + $0x428] sm:$0xff] }
  0xbe   :  { %v3851_v8 = vcombine.high %v221_v2, %v225_v3  ;;  %v301_v49 = vld [vmem:[#allocation5 + $0x688] sm:$0xff] }
  0xbf   :  { %2583 = vmatpush2.bf16.msra.mxu0 %v4048_v5  ;;  %v353_v5 = vld [vmem:[#allocation5 + $0x828] sm:$0xff] }
  0xc0   :  { %2626 = vmatpush2.bf16.msra.mxu1 %v3794_v6  ;;  %2584 = vmatprep.subr.bf16.mxu0 %v4041_v7  ;;  %v3858_v6 = vcombine.low %v229_v57, %v233_v58  ;;  %v3986_v7 = vcombine.low %v357_v60, %v361_v61  ;;  %v3979_v9 = vcombine.high %v349_v4, %v353_v5  ;;  %v305_v50 = vld [vmem:[#allocation5 + $0x6a8] sm:$0xff] }
  0xc1   :  { %2627 = vmatprep.subr.bf16.mxu1 %v3787_v11  ;;  %v345_v11 = vld [vmem:[#allocation5 + $0x7e8] sm:$0xff] }
  0xc2   :  { %v3971_v18 = vcombine.high %v341_v10, %v345_v11  ;;  %v429_v51 = vld [vmem:[#allocation5 + $0xa88] sm:$0xff] }
  0xc3   :  { %2585 = vmatpush2.bf16.msra.mxu0 %v4040_v14  ;;  %v473_v14 = vld [vmem:[#allocation5 + $0xbe8] sm:$0xff] }
  0xc4   :  { %2628 = vmatpush2.bf16.msra.mxu1 %v3786_v15  ;;  %2640 = vmatprep.subr.bf16.mxu0 %v3907_v17  ;;  %v3850_v15 = vcombine.low %v221_v2, %v225_v3  ;;  %v3978_v17 = vcombine.low %v349_v4, %v353_v5  ;;  %v4099_v19 = vcombine.high %v469_v13, %v473_v14  ;;  %v293_v58 = vld [vmem:[#allocation5 + $0x648] sm:$0xff] }
  0xc5   :  { %2683 = vmatprep.subr.bf16.mxu1 %v4035_v21  ;;  %v337_v21 = vld [vmem:[#allocation5 + $0x7a8] sm:$0xff] }
  0xc6   :  { %2587 = vmatmul.mubr.bf16.vlgmr.msra.gmra.mxu0 %v4587_v16  ;;  %v3963_v27 = vcombine.high %v333_v20, %v337_v21  ;;  %v297_v60 = vld [vmem:[#allocation5 + $0x668] sm:$0xff] }
  0xc7   :  { %2630 = vmatmul.mubr.bf16.vlgmr.msra.gmra.mxu1 %v4580_v12  ;;  %2641 = vmatpush1.bf16.msra.mxu0 %v3906_v24  ;;  %v4018_v12 = vcombine.low %v389_v30, %v393_v31  ;;  %v465_v24 = vld [vmem:[#allocation5 + $0xba8] sm:$0xff] }
  0xc8   :  { %2684 = vmatpush1.bf16.msra.mxu1 %v4034_v25  ;;  %2642 = vmatprep.subr.bf16.mxu0 %v3899_v26  ;;  %v3970_v25 = vcombine.low %v341_v10, %v345_v11  ;;  %v4098_v26 = vcombine.low %v469_v13, %v473_v14  ;;  %v329_v30 = vld [vmem:[#allocation5 + $0x768] sm:$0xff]  ;;  %v150_v11 = vld [vmem:[#allocation5 + $0x1d0] sm:$0xff] }
  0xc9   :  { %2685 = vmatprep.subr.bf16.mxu1 %v4027_v28  ;;  %2672 = vmatprep.mubr.bf16.mxu0 %v4576_v59  ;;  %v4010_v59 = vcombine.low %v381_v38, %v385_v39  ;;  %v4091_v28 = vcombine.high %v461_v23, %v465_v24  ;;  %v453_v31 = vld [vmem:[#allocation5 + $0xb48] sm:$0xff]  ;;  %v3955_v35 = vcombine.high %v325_v29, %v329_v30  ;;  %v154_v13 = vld [vmem:[#allocation5 + $0x1f0] sm:$0xff] }
  0xca   :  { %2715 = vmatprep.mubr.bf16.mxu1 %v4582_v22  ;;  %v4003_v22 = vcombine.high %v373_v56, %v377_v45  ;;  %v321_v38 = vld [vmem:[#allocation5 + $0x728] sm:$0xff]  ;;  %v278_v14 = vld [vmem:[#allocation5 + $0x5d0] sm:$0xff] }
  0xcb   :  { %2643 = vmatpush1.bf16.msra.mxu0 %v3898_v32  ;;  %v457_v32 = vld [vmem:[#allocation5 + $0xb68] sm:$0xff] }
  0xcc   :  { %2686 = vmatpush1.bf16.msra.mxu1 %v4026_v33  ;;  %2644 = vmatprep.subr.bf16.mxu0 %v3891_v34  ;;  %v3962_v33 = vcombine.low %v333_v20, %v337_v21  ;;  %v4090_v34 = vcombine.low %v461_v23, %v465_v24  ;;  %v4083_v36 = vcombine.high %v453_v31, %v457_v32  ;;  %v445_v39 = vld [vmem:[#allocation5 + $0xb08] sm:$0xff]  ;;  %v142_v21 = vld [vmem:[#allocation5 + $0x190] sm:$0xff] }
  0xcd   :  { %2687 = vmatprep.subr.bf16.mxu1 %v4019_v37  ;;  %v317_v37 = vld [vmem:[#allocation5 + $0x708] sm:$0xff]  ;;  %v146_v23 = vld [vmem:[#allocation5 + $0x1b0] sm:$0xff] }
  0xce   :  { %v313_v56 = vld [vmem:[#allocation5 + $0x6e8] sm:$0xff]  ;;  %v270_v24 = vld [vmem:[#allocation5 + $0x590] sm:$0xff] }
  0xcf   :  { %2645 = vmatpush1.bf16.msra.mxu0 %v3890_v40  ;;  %v449_v40 = vld [vmem:[#allocation5 + $0xb28] sm:$0xff] }
  0xd0   :  { %2688 = vmatpush1.bf16.msra.mxu1 %v4018_v12  ;;  %2646 = vmatprep.subr.bf16.mxu0 %v3883_v41  ;;  %v3954_v12 = vcombine.low %v325_v29, %v329_v30  ;;  %v4082_v41 = vcombine.low %v453_v31, %v457_v32  ;;  %v4075_v43 = vcombine.high %v445_v39, %v449_v40  ;;  %v437_v45 = vld [vmem:[#allocation5 + $0xac8] sm:$0xff]  ;;  %v134_v30 = vld [vmem:[#allocation5 + $0x150] sm:$0xff] }
  0xd1   :  { %2689 = vmatprep.subr.bf16.mxu1 %v4011_v42  ;;  %v3947_v42 = vcombine.high %v317_v37, %v321_v38  ;;  %v421_v61 = vld [vmem:[#allocation5 + $0xa48] sm:$0xff]  ;;  %v138_v31 = vld [vmem:[#allocation5 + $0x170] sm:$0xff] }
  0xd2   :  { %v285_v3 = vld [vmem:[#allocation5 + $0x608] sm:$0xff]  ;;  %v4593_v32 = vld [vmem:[#allocation2 + $0x8] ss:$24 sps:$4 sm:$0xff]  }
  0xd3   :  { %2647 = vmatpush1.bf16.msra.mxu0 %v3882_v46  ;;  %v441_v46 = vld [vmem:[#allocation5 + $0xae8] sm:$0xff] }
  0xd4   :  { %2690 = vmatpush1.bf16.msra.mxu1 %v4010_v59  ;;  %2648 = vmatprep.subr.bf16.mxu0 %v3875_v47  ;;  %v3946_v59 = vcombine.low %v317_v37, %v321_v38  ;;  %v4074_v47 = vcombine.low %v445_v39, %v449_v40  ;;  %v4067_v48 = vcombine.high %v437_v45, %v441_v46  ;;  %v289_v4 = vld [vmem:[#allocation5 + $0x628] sm:$0xff]  ;;  %v126_v39 = vld [vmem:[#allocation5 + $0x110] sm:$0xff] }
  0xd5   :  { %2691 = vmatprep.subr.bf16.mxu1 %v4003_v22  ;;  %v3939_v22 = vcombine.high %v309_v44, %v313_v56  ;;  %v413_v5 = vld [vmem:[#allocation5 + $0xa08] sm:$0xff]  ;;  %v3765_v37 = vcombine.high %v134_v30, %v138_v31  ;;  %v130_v40 = vld [vmem:[#allocation5 + $0x130] sm:$0xff] }
  0xd7   :  { %2649 = vmatpush1.bf16.msra.mxu0 %v3874_v52  ;;  %v433_v52 = vld [vmem:[#allocation5 + $0xaa8] sm:$0xff] }
  0xd8   :  { %2692 = vmatpush1.bf16.msra.mxu1 %v4002_v53  ;;  %2650 = vmatprep.subr.bf16.mxu0 %v3867_v54  ;;  %v3938_v53 = vcombine.low %v309_v44, %v313_v56  ;;  %v4066_v54 = vcombine.low %v437_v45, %v441_v46  ;;  %v4059_v57 = vcombine.high %v429_v51, %v433_v52  ;;  %v118_v46 = vld [vmem:[#allocation5 + $0xd0] sm:$0xff] }
  0xd9   :  { %2693 = vmatprep.subr.bf16.mxu1 %v3995_v55  ;;  %v3931_v55 = vcombine.high %v301_v49, %v305_v50  ;;  %v3757_v56 = vcombine.high %v126_v39, %v130_v40 }
  0xdb   :  { %2651 = vmatpush1.bf16.msra.mxu0 %v3866_v62  ;;  %v425_v62 = vld [vmem:[#allocation5 + $0xa68] sm:$0xff] }
  0xdc   :  { %2694 = vmatpush1.bf16.msra.mxu1 %v3994_v63  ;;  %2652 = vmatprep.subr.bf16.mxu0 %v3859_v0  ;;  %v3930_v63 = vcombine.low %v301_v49, %v305_v50  ;;  %v4058_v0 = vcombine.low %v429_v51, %v433_v52  ;;  %v4051_v2 = vcombine.high %v421_v61, %v425_v62  ;;  %v110_v52 = vld [vmem:[#allocation5 + $0x90] sm:$0xff] }
  0xdd   :  { %2695 = vmatprep.subr.bf16.mxu1 %v3987_v1  ;;  %v3923_v1 = vcombine.high %v293_v58, %v297_v60 }
  0xdf   :  { %2653 = vmatpush1.bf16.msra.mxu0 %v3858_v6  ;;  %v417_v6 = vld [vmem:[#allocation5 + $0xa28] sm:$0xff] }
  0xe0   :  { %2696 = vmatpush1.bf16.msra.mxu1 %v3986_v7  ;;  %2654 = vmatprep.subr.bf16.mxu0 %v3851_v8  ;;  %v3922_v7 = vcombine.low %v293_v58, %v297_v60  ;;  %v4050_v8 = vcombine.low %v421_v61, %v425_v62  ;;  %v4043_v10 = vcombine.high %v413_v5, %v417_v6  ;;  %v102_v62 = vld [vmem:[#allocation5 + $0x50] sm:$0xff] }
  0xe1   :  { %2697 = vmatprep.subr.bf16.mxu1 %v3979_v9  ;;  %v3915_v9 = vcombine.high %v285_v3, %v289_v4 }
  0xe3   :  { %2655 = vmatpush1.bf16.msra.mxu0 %v3850_v15  ;;  %v282_v15 = vld [vmem:[#allocation5 + $0x5f0] sm:$0xff] }
  0xe4   :  { %2698 = vmatpush1.bf16.msra.mxu1 %v3978_v17  ;;  %2656 = vmatprep.subr.bf16.mxu0 %v3971_v18  ;;  %v3914_v17 = vcombine.low %v285_v3, %v289_v4  ;;  %v4042_v18 = vcombine.low %v413_v5, %v417_v6  ;;  %v3909_v20 = vcombine.high %v278_v14, %v282_v15  ;;  %v94_v6 = vld [vmem:[#allocation5 + $0x10] sm:$0xff] }
  0xe5   :  { %2699 = vmatprep.subr.bf16.mxu1 %v4099_v19  ;;  %v3781_v19 = vcombine.high %v150_v11, %v154_v13 }
  0xe7   :  { %2657 = vmatpush2.bf16.msra.mxu0 %v3970_v25  ;;  %v274_v25 = vld [vmem:[#allocation5 + $0x5b0] sm:$0xff] }
  0xe8   :  { %2700 = vmatpush2.bf16.msra.mxu1 %v4098_v26  ;;  %2658 = vmatprep.subr.bf16.mxu0 %v3963_v27  ;;  %v3780_v26 = vcombine.low %v150_v11, %v154_v13  ;;  %v3908_v27 = vcombine.low %v278_v14, %v282_v15  ;;  %v3901_v29 = vcombine.high %v270_v24, %v274_v25  ;;  %v214_v15 = vld [vmem:[#allocation5 + $0x3d0] sm:$0xff] }
  0xe9   :  { %2701 = vmatprep.subr.bf16.mxu1 %v4091_v28  ;;  %v3773_v28 = vcombine.high %v142_v21, %v146_v23 }
  0xeb   :  { %2659 = vmatpush2.bf16.msra.mxu0 %v3962_v33  ;;  %v262_v33 = vld [vmem:[#allocation5 + $0x550] sm:$0xff] }
  0xec   :  { %2702 = vmatpush2.bf16.msra.mxu1 %v4090_v34  ;;  %2660 = vmatprep.subr.bf16.mxu0 %v3955_v35  ;;  %v266_v34 = vld [vmem:[#allocation5 + $0x570] sm:$0xff]  ;;  %v3772_v35 = vcombine.low %v142_v21, %v146_v23 }
  0xed   :  { %2703 = vmatprep.subr.bf16.mxu1 %v4083_v36  ;;  %v3900_v36 = vcombine.low %v270_v24, %v274_v25  ;;  %v3893_v38 = vcombine.high %v262_v33, %v266_v34  ;;  %v3892_v44 = vcombine.low %v262_v33, %v266_v34  ;;  %v206_v25 = vld [vmem:[#allocation5 + $0x390] sm:$0xff] }
  0xee   :  { %v198_v34 = vld [vmem:[#allocation5 + $0x350] sm:$0xff] }
  0xef   :  { %2661 = vmatpush2.bf16.msra.mxu0 %v3954_v12  ;;  %v4597_v12 = vld [vmem:[#allocation2 + $0x4] ss:$24 sps:$4 sm:$0xff]  }
  0xf0   :  { %2704 = vmatpush2.bf16.msra.mxu1 %v4082_v41  ;;  %2662 = vmatprep.subr.bf16.mxu0 %v3947_v42  ;;  %v254_v41 = vld [vmem:[#allocation5 + $0x510] sm:$0xff] }
  0xf1   :  { %2705 = vmatprep.subr.bf16.mxu1 %v4075_v43  ;;  %v258_v42 = vld [vmem:[#allocation5 + $0x530] sm:$0xff] }
  0xf2   :  { %v4600_v43 = vld [vmem:[#allocation2 + $0xc] ss:$24 sps:$4 sm:$0xff]   ;;  %v3885_v45 = vcombine.high %v254_v41, %v258_v42  ;;  %v3884_v49 = vcombine.low %v254_v41, %v258_v42 }
  0xf3   :  { %2663 = vmatpush2.bf16.msra.mxu0 %v3946_v59  ;;  %v122_v59 = vld [vmem:[#allocation5 + $0xf0] sm:$0xff] }
  0xf4   :  { %2706 = vmatpush2.bf16.msra.mxu1 %v4074_v47  ;;  %2664 = vmatprep.subr.bf16.mxu0 %v3939_v22  ;;  %v246_v47 = vld [vmem:[#allocation5 + $0x4d0] sm:$0xff]  ;;  %v3749_v50 = vcombine.high %v118_v46, %v122_v59 }
  0xf5   :  { %2707 = vmatprep.subr.bf16.mxu1 %v4067_v48  ;;  %v250_v22 = vld [vmem:[#allocation5 + $0x4f0] sm:$0xff]  ;;  %v3756_v48 = vcombine.low %v126_v39, %v130_v40 }
  0xf6   :  { %v3877_v51 = vcombine.high %v246_v47, %v250_v22  ;;  %v3876_v58 = vcombine.low %v246_v47, %v250_v22  ;;  %v190_v42 = vld [vmem:[#allocation5 + $0x310] sm:$0xff] }
  0xf7   :  { %2665 = vmatpush2.bf16.msra.mxu0 %v3938_v53  ;;  %v114_v53 = vld [vmem:[#allocation5 + $0xb0] sm:$0xff] }
  0xf8   :  { %2708 = vmatpush2.bf16.msra.mxu1 %v4066_v54  ;;  %2666 = vmatprep.subr.bf16.mxu0 %v3931_v55  ;;  %v238_v54 = vld [vmem:[#allocation5 + $0x490] sm:$0xff]  ;;  %v3741_v60 = vcombine.high %v110_v52, %v114_v53 }
  0xf9   :  { %2709 = vmatprep.subr.bf16.mxu1 %v4059_v57  ;;  %v242_v55 = vld [vmem:[#allocation5 + $0x4b0] sm:$0xff]  ;;  %v3748_v57 = vcombine.low %v118_v46, %v122_v59 }
  0xfa   :  { %v3869_v61 = vcombine.high %v238_v54, %v242_v55  ;;  %v3868_v3 = vcombine.low %v238_v54, %v242_v55  ;;  %v182_v22 = vld [vmem:[#allocation5 + $0x2d0] sm:$0xff] }
  0xfb   :  { %2667 = vmatpush2.bf16.msra.mxu0 %v3930_v63  ;;  %v106_v63 = vld [vmem:[#allocation5 + $0x70] sm:$0xff] }
  0xfc   :  { %2710 = vmatpush2.bf16.msra.mxu1 %v4058_v0  ;;  %2668 = vmatprep.subr.bf16.mxu0 %v3923_v1  ;;  %v230_v0 = vld [vmem:[#allocation5 + $0x450] sm:$0xff]  ;;  %v3733_v4 = vcombine.high %v102_v62, %v106_v63 }
  0xfd   :  { %2711 = vmatprep.subr.bf16.mxu1 %v4051_v2  ;;  %v234_v1 = vld [vmem:[#allocation5 + $0x470] sm:$0xff]  ;;  %v3740_v2 = vcombine.low %v110_v52, %v114_v53 }
  0xfe   :  { %v3861_v5 = vcombine.high %v230_v0, %v234_v1  ;;  %v3860_v11 = vcombine.low %v230_v0, %v234_v1  ;;  %v174_v55 = vld [vmem:[#allocation5 + $0x290] sm:$0xff] }
  0xff   :  { %2669 = vmatpush2.bf16.msra.mxu0 %v3922_v7  ;;  %v98_v7 = vld [vmem:[#allocation5 + $0x30] sm:$0xff] }
 0x100   :  { %2712 = vmatpush2.bf16.msra.mxu1 %v4050_v8  ;;  %2670 = vmatprep.subr.bf16.mxu0 %v3915_v9  ;;  %v222_v8 = vld [vmem:[#allocation5 + $0x410] sm:$0xff]  ;;  %v3725_v13 = vcombine.high %v94_v6, %v98_v7 }
 0x101   :  { %2713 = vmatprep.subr.bf16.mxu1 %v4043_v10  ;;  %v226_v9 = vld [vmem:[#allocation5 + $0x430] sm:$0xff]  ;;  %v3732_v10 = vcombine.low %v102_v62, %v106_v63 }
 0x102   :  { %v3853_v14 = vcombine.high %v222_v8, %v226_v9  ;;  %v3852_v21 = vcombine.low %v222_v8, %v226_v9  ;;  %v166_v1 = vld [vmem:[#allocation5 + $0x250] sm:$0xff] }
 0x103   :  { %2671 = vmatpush2.bf16.msra.mxu0 %v3914_v17  ;;  %v218_v17 = vld [vmem:[#allocation5 + $0x3f0] sm:$0xff] }
 0x104   :  { %2714 = vmatpush2.bf16.msra.mxu1 %v4042_v18  ;;  %2726 = vmatprep.subr.bf16.mxu0 %v3781_v19  ;;  %v342_v18 = vld [vmem:[#allocation5 + $0x7d0] sm:$0xff]  ;;  %v3845_v23 = vcombine.high %v214_v15, %v218_v17 }
 0x105   :  { %2769 = vmatprep.subr.bf16.mxu1 %v3909_v20  ;;  %v346_v19 = vld [vmem:[#allocation5 + $0x7f0] sm:$0xff]  ;;  %v3724_v20 = vcombine.low %v94_v6, %v98_v7 }
 0x106   :  { %2673 = vmatmul.mubr.bf16.vlgmr.msra.gmra.mxu0 %v4593_v32  ;;  %v3973_v24 = vcombine.high %v342_v18, %v346_v19  ;;  %v158_v9 = vld [vmem:[#allocation5 + $0x210] sm:$0xff] }
 0x107   :  { %2716 = vmatmul.mubr.bf16.vlgmr.msra.gmra.mxu1 %v4587_v16  ;;  %2727 = vmatpush1.bf16.msra.mxu0 %v3780_v26  ;;  %v3764_v16 = vcombine.low %v134_v30, %v138_v31  ;;  %v210_v26 = vld [vmem:[#allocation5 + $0x3b0] sm:$0xff]  ;;  %v3972_v30 = vcombine.low %v342_v18, %v346_v19 }
 0x108   :  { %2770 = vmatpush1.bf16.msra.mxu1 %v3908_v27  ;;  %2728 = vmatprep.subr.bf16.mxu0 %v3773_v28  ;;  %v334_v27 = vld [vmem:[#allocation5 + $0x790] sm:$0xff]  ;;  %v3837_v31 = vcombine.high %v206_v25, %v210_v26 }
 0x109   :  { %2771 = vmatprep.subr.bf16.mxu1 %v3901_v29  ;;  %2758 = vmatprep.mubr.bf16.mxu0 %v4597_v12  ;;  %v338_v28 = vld [vmem:[#allocation5 + $0x7b0] sm:$0xff]  ;;  %v3844_v29 = vcombine.low %v214_v15, %v218_v17 }
 0x10a   :  { %2801 = vmatprep.mubr.bf16.mxu1 %v4600_v43  ;;  %v3965_v33 = vcombine.high %v334_v27, %v338_v28  ;;  %v3964_v39 = vcombine.low %v334_v27, %v338_v28  ;;  %v406_v19 = vld [vmem:[#allocation5 + $0x9d0] sm:$0xff] }
 0x10b   :  { %2729 = vmatpush1.bf16.msra.mxu0 %v3772_v35  ;;  %v202_v35 = vld [vmem:[#allocation5 + $0x370] sm:$0xff] }
 0x10c   :  { %2772 = vmatpush1.bf16.msra.mxu1 %v3900_v36  ;;  %2730 = vmatprep.subr.bf16.mxu0 %v3765_v37  ;;  %v326_v36 = vld [vmem:[#allocation5 + $0x750] sm:$0xff]  ;;  %v3829_v40 = vcombine.high %v198_v34, %v202_v35 }
 0x10d   :  { %2773 = vmatprep.subr.bf16.mxu1 %v3893_v38  ;;  %v330_v37 = vld [vmem:[#allocation5 + $0x770] sm:$0xff]  ;;  %v3836_v38 = vcombine.low %v206_v25, %v210_v26 }
 0x10e   :  { %v3957_v41 = vcombine.high %v326_v36, %v330_v37  ;;  %v3956_v46 = vcombine.low %v326_v36, %v330_v37  ;;  %v398_v28 = vld [vmem:[#allocation5 + $0x990] sm:$0xff] }
 0x10f   :  { %2731 = vmatpush1.bf16.msra.mxu0 %v3764_v16  ;;  %v194_v16 = vld [vmem:[#allocation5 + $0x330] sm:$0xff] }
 0x110   :  { %2774 = vmatpush1.bf16.msra.mxu1 %v3892_v44  ;;  %2732 = vmatprep.subr.bf16.mxu0 %v3757_v56  ;;  %v318_v44 = vld [vmem:[#allocation5 + $0x710] sm:$0xff]  ;;  %v3821_v59 = vcombine.high %v190_v42, %v194_v16 }
 0x111   :  { %2775 = vmatprep.subr.bf16.mxu1 %v3885_v45  ;;  %v322_v56 = vld [vmem:[#allocation5 + $0x730] sm:$0xff]  ;;  %v3828_v45 = vcombine.low %v198_v34, %v202_v35 }
 0x112   :  { %v3949_v47 = vcombine.high %v318_v44, %v322_v56  ;;  %v3948_v52 = vcombine.low %v318_v44, %v322_v56  ;;  %v390_v37 = vld [vmem:[#allocation5 + $0x950] sm:$0xff] }
 0x113   :  { %2733 = vmatpush1.bf16.msra.mxu0 %v3756_v48  ;;  %v186_v48 = vld [vmem:[#allocation5 + $0x2f0] sm:$0xff] }
 0x114   :  { %2776 = vmatpush1.bf16.msra.mxu1 %v3884_v49  ;;  %2734 = vmatprep.subr.bf16.mxu0 %v3749_v50  ;;  %v310_v49 = vld [vmem:[#allocation5 + $0x6d0] sm:$0xff]  ;;  %v3813_v53 = vcombine.high %v182_v22, %v186_v48 }
 0x115   :  { %2777 = vmatprep.subr.bf16.mxu1 %v3877_v51  ;;  %v314_v50 = vld [vmem:[#allocation5 + $0x6f0] sm:$0xff]  ;;  %v3820_v51 = vcombine.low %v190_v42, %v194_v16 }
 0x116   :  { %v3941_v54 = vcombine.high %v310_v49, %v314_v50  ;;  %v3940_v62 = vcombine.low %v310_v49, %v314_v50 }
 0x117   :  { %2735 = vmatpush1.bf16.msra.mxu0 %v3748_v57  ;;  %v178_v57 = vld [vmem:[#allocation5 + $0x2b0] sm:$0xff] }
 0x118   :  { %2778 = vmatpush1.bf16.msra.mxu1 %v3876_v58  ;;  %2736 = vmatprep.subr.bf16.mxu0 %v3741_v60  ;;  %v302_v58 = vld [vmem:[#allocation5 + $0x690] sm:$0xff]  ;;  %v3805_v63 = vcombine.high %v174_v55, %v178_v57 }
 0x119   :  { %2779 = vmatprep.subr.bf16.mxu1 %v3869_v61  ;;  %v306_v60 = vld [vmem:[#allocation5 + $0x6b0] sm:$0xff]  ;;  %v3812_v61 = vcombine.low %v182_v22, %v186_v48  ;;  %v131_v22 = vld [vmem:[#allocation5 + $0x138] sm:$0xff] }
 0x11a   :  { %v3933_v0 = vcombine.high %v302_v58, %v306_v60  ;;  %v3932_v6 = vcombine.low %v302_v58, %v306_v60  ;;  %v366_v60 = vld [vmem:[#allocation5 + $0x890] sm:$0xff] }
 0x11b   :  { %2737 = vmatpush1.bf16.msra.mxu0 %v3740_v2  ;;  %v170_v2 = vld [vmem:[#allocation5 + $0x270] sm:$0xff] }
 0x11c   :  { %2780 = vmatpush1.bf16.msra.mxu1 %v3868_v3  ;;  %2738 = vmatprep.subr.bf16.mxu0 %v3733_v4  ;;  %v294_v3 = vld [vmem:[#allocation5 + $0x650] sm:$0xff]  ;;  %v3797_v7 = vcombine.high %v166_v1, %v170_v2 }
 0x11d   :  { %2781 = vmatprep.subr.bf16.mxu1 %v3861_v5  ;;  %v298_v4 = vld [vmem:[#allocation5 + $0x670] sm:$0xff]  ;;  %v3804_v5 = vcombine.low %v174_v55, %v178_v57 }
 0x11e   :  { %v3925_v8 = vcombine.high %v294_v3, %v298_v4  ;;  %v3924_v15 = vcombine.low %v294_v3, %v298_v4  ;;  %v358_v4 = vld [vmem:[#allocation5 + $0x850] sm:$0xff] }
 0x11f   :  { %2739 = vmatpush1.bf16.msra.mxu0 %v3732_v10  ;;  %v162_v10 = vld [vmem:[#allocation5 + $0x230] sm:$0xff] }
 0x120   :  { %2782 = vmatpush1.bf16.msra.mxu1 %v3860_v11  ;;  %2740 = vmatprep.subr.bf16.mxu0 %v3725_v13  ;;  %v286_v11 = vld [vmem:[#allocation5 + $0x610] sm:$0xff]  ;;  %v3789_v17 = vcombine.high %v158_v9, %v162_v10 }
 0x121   :  { %2783 = vmatprep.subr.bf16.mxu1 %v3853_v14  ;;  %v290_v13 = vld [vmem:[#allocation5 + $0x630] sm:$0xff]  ;;  %v3796_v14 = vcombine.low %v166_v1, %v170_v2 }
 0x122   :  { %v3917_v18 = vcombine.high %v286_v11, %v290_v13  ;;  %v3916_v25 = vcombine.low %v286_v11, %v290_v13  ;;  %v350_v13 = vld [vmem:[#allocation5 + $0x810] sm:$0xff] }
 0x123   :  { %2741 = vmatpush1.bf16.msra.mxu0 %v3724_v20  ;;  %v410_v20 = vld [vmem:[#allocation5 + $0x9f0] sm:$0xff] }
 0x124   :  { %2784 = vmatpush1.bf16.msra.mxu1 %v3852_v21  ;;  %2742 = vmatprep.subr.bf16.mxu0 %v3845_v23  ;;  %v151_v21 = vld [vmem:[#allocation5 + $0x1d8] sm:$0xff]  ;;  %v4037_v26 = vcombine.high %v406_v19, %v410_v20 }
 0x125   :  { %2785 = vmatprep.subr.bf16.mxu1 %v3973_v24  ;;  %v155_v23 = vld [vmem:[#allocation5 + $0x1f8] sm:$0xff]  ;;  %v3788_v24 = vcombine.low %v158_v9, %v162_v10 }
 0x126   :  { %v3783_v27 = vcombine.high %v151_v21, %v155_v23  ;;  %v3782_v34 = vcombine.low %v151_v21, %v155_v23  ;;  %v470_v23 = vld [vmem:[#allocation5 + $0xbd0] sm:$0xff] }
 0x127   :  { %2743 = vmatpush2.bf16.msra.mxu0 %v3844_v29  ;;  %v402_v29 = vld [vmem:[#allocation5 + $0x9b0] sm:$0xff] }
 0x128   :  { %2786 = vmatpush2.bf16.msra.mxu1 %v3972_v30  ;;  %2744 = vmatprep.subr.bf16.mxu0 %v3837_v31  ;;  %v143_v30 = vld [vmem:[#allocation5 + $0x198] sm:$0xff]  ;;  %v4029_v35 = vcombine.high %v398_v28, %v402_v29  ;;  %v4028_v42 = vcombine.low %v398_v28, %v402_v29 }
 0x129   :  { %2787 = vmatprep.subr.bf16.mxu1 %v3965_v33  ;;  %v147_v31 = vld [vmem:[#allocation5 + $0x1b8] sm:$0xff]  ;;  %v4036_v33 = vcombine.low %v406_v19, %v410_v20 }
 0x12a   :  { %v3775_v36 = vcombine.high %v143_v30, %v147_v31  ;;  %v3774_v16 = vcombine.low %v143_v30, %v147_v31  ;;  %v462_v31 = vld [vmem:[#allocation5 + $0xb90] sm:$0xff] }
 0x12b   :  { %2745 = vmatpush2.bf16.msra.mxu0 %v3836_v38  ;;  %v394_v38 = vld [vmem:[#allocation5 + $0x970] sm:$0xff] }
 0x12c   :  { %2788 = vmatpush2.bf16.msra.mxu1 %v3964_v39  ;;  %2746 = vmatprep.subr.bf16.mxu0 %v3829_v40  ;;  %v4603_v39 = vld [vmem:[#allocation2] ss:$24 sps:$4 sm:$0xff]   ;;  %v135_v40 = vld [vmem:[#allocation5 + $0x158] sm:$0xff]  ;;  %v4021_v44 = vcombine.high %v390_v37, %v394_v38 }
 0x12d   :  { %2789 = vmatprep.subr.bf16.mxu1 %v3957_v41  ;;  %v139_v41 = vld [vmem:[#allocation5 + $0x178] sm:$0xff] }
 0x12e   :  { %v3767_v56 = vcombine.high %v135_v40, %v139_v41  ;;  %v3766_v48 = vcombine.low %v135_v40, %v139_v41  ;;  %v454_v41 = vld [vmem:[#allocation5 + $0xb50] sm:$0xff] }
 0x12f   :  { %2747 = vmatpush2.bf16.msra.mxu0 %v3828_v45  ;;  %v382_v45 = vld [vmem:[#allocation5 + $0x910] sm:$0xff] }
 0x130   :  { %2790 = vmatpush2.bf16.msra.mxu1 %v3956_v46  ;;  %2748 = vmatprep.subr.bf16.mxu0 %v3821_v59  ;;  %v386_v46 = vld [vmem:[#allocation5 + $0x930] sm:$0xff]  ;;  %v4607_v59 = vld [vmem:[#allocation2 + $0x14] ss:$24 sps:$4 sm:$0xff]  }
 0x131   :  { %2791 = vmatprep.subr.bf16.mxu1 %v3949_v47  ;;  %v127_v47 = vld [vmem:[#allocation5 + $0x118] sm:$0xff]  ;;  %v4013_v49 = vcombine.high %v382_v45, %v386_v46  ;;  %v4012_v55 = vcombine.low %v382_v45, %v386_v46 }
 0x132   :  { %v3759_v50 = vcombine.high %v127_v47, %v131_v22  ;;  %v3758_v57 = vcombine.low %v127_v47, %v131_v22  ;;  %v446_v22 = vld [vmem:[#allocation5 + $0xb10] sm:$0xff] }
 0x133   :  { %2749 = vmatpush2.bf16.msra.mxu0 %v3820_v51  ;;  %v374_v51 = vld [vmem:[#allocation5 + $0x8d0] sm:$0xff] }
 0x134   :  { %2792 = vmatpush2.bf16.msra.mxu1 %v3948_v52  ;;  %2750 = vmatprep.subr.bf16.mxu0 %v3813_v53  ;;  %v378_v52 = vld [vmem:[#allocation5 + $0x8f0] sm:$0xff]  ;;  %v119_v53 = vld [vmem:[#allocation5 + $0xd8] sm:$0xff] }
 0x135   :  { %2793 = vmatprep.subr.bf16.mxu1 %v3941_v54  ;;  %v123_v54 = vld [vmem:[#allocation5 + $0xf8] sm:$0xff]  ;;  %v4005_v58 = vcombine.high %v374_v51, %v378_v52 }
 0x136   :  { %v3750_v1 = vcombine.low %v119_v53, %v123_v54 }
 0x137   :  { %2751 = vmatpush2.bf16.msra.mxu0 %v3812_v61  ;;  %v370_v61 = vld [vmem:[#allocation5 + $0x8b0] sm:$0xff] }
 0x138   :  { %2794 = vmatpush2.bf16.msra.mxu1 %v3940_v62  ;;  %2752 = vmatprep.subr.bf16.mxu0 %v3805_v63  ;;  %v111_v62 = vld [vmem:[#allocation5 + $0x98] sm:$0xff]  ;;  %v3997_v2 = vcombine.high %v366_v60, %v370_v61 }
 0x139   :  { %2795 = vmatprep.subr.bf16.mxu1 %v3933_v0  ;;  %v115_v63 = vld [vmem:[#allocation5 + $0xb8] sm:$0xff]  ;;  %v4004_v0 = vcombine.low %v374_v51, %v378_v52 }
 0x13a   :  { %v3743_v3 = vcombine.high %v111_v62, %v115_v63  ;;  %v3742_v9 = vcombine.low %v111_v62, %v115_v63  ;;  %v430_v63 = vld [vmem:[#allocation5 + $0xa90] sm:$0xff] }
 0x13b   :  { %2753 = vmatpush2.bf16.msra.mxu0 %v3804_v5  ;;  %v362_v5 = vld [vmem:[#allocation5 + $0x870] sm:$0xff] }
 0x13c   :  { %2796 = vmatpush2.bf16.msra.mxu1 %v3932_v6  ;;  %2754 = vmatprep.subr.bf16.mxu0 %v3797_v7  ;;  %v103_v6 = vld [vmem:[#allocation5 + $0x58] sm:$0xff]  ;;  %v3989_v10 = vcombine.high %v358_v4, %v362_v5 }
 0x13d   :  { %2797 = vmatprep.subr.bf16.mxu1 %v3925_v8  ;;  %v107_v7 = vld [vmem:[#allocation5 + $0x78] sm:$0xff]  ;;  %v3996_v8 = vcombine.low %v366_v60, %v370_v61 }
 0x13e   :  { %v3735_v11 = vcombine.high %v103_v6, %v107_v7  ;;  %v3734_v19 = vcombine.low %v103_v6, %v107_v7  ;;  %v422_v7 = vld [vmem:[#allocation5 + $0xa50] sm:$0xff] }
 0x13f   :  { %2755 = vmatpush2.bf16.msra.mxu0 %v3796_v14  ;;  %v354_v14 = vld [vmem:[#allocation5 + $0x830] sm:$0xff] }
 0x140   :  { %2798 = vmatpush2.bf16.msra.mxu1 %v3924_v15  ;;  %2756 = vmatprep.subr.bf16.mxu0 %v3789_v17  ;;  %v95_v15 = vld [vmem:[#allocation5 + $0x18] sm:$0xff]  ;;  %v3981_v20 = vcombine.high %v350_v13, %v354_v14 }
 0x141   :  { %2799 = vmatprep.subr.bf16.mxu1 %v3917_v18  ;;  %v99_v17 = vld [vmem:[#allocation5 + $0x38] sm:$0xff]  ;;  %v3988_v18 = vcombine.low %v358_v4, %v362_v5 }
 0x142   :  { %v3727_v21 = vcombine.high %v95_v15, %v99_v17  ;;  %v3726_v28 = vcombine.low %v95_v15, %v99_v17  ;;  %v414_v17 = vld [vmem:[#allocation5 + $0xa10] sm:$0xff] }
 0x143   :  { %2757 = vmatpush2.bf16.msra.mxu0 %v3788_v24  ;;  %v474_v24 = vld [vmem:[#allocation5 + $0xbf0] sm:$0xff] }
 0x144   :  { %2800 = vmatpush2.bf16.msra.mxu1 %v3916_v25  ;;  %2812 = vmatprep.subr.bf16.mxu0 %v4037_v26  ;;  %v215_v25 = vld [vmem:[#allocation5 + $0x3d8] sm:$0xff]  ;;  %v4101_v29 = vcombine.high %v470_v23, %v474_v24 }
 0x145   :  { %2855 = vmatprep.subr.bf16.mxu1 %v3783_v27  ;;  %v219_v26 = vld [vmem:[#allocation5 + $0x3f8] sm:$0xff]  ;;  %v3980_v27 = vcombine.low %v350_v13, %v354_v14 }
 0x146   :  { %2759 = vmatmul.mubr.bf16.vlgmr.msra.gmra.mxu0 %v4603_v39  ;;  %v3847_v30 = vcombine.high %v215_v25, %v219_v26 }
 0x147   :  { %2802 = vmatmul.mubr.bf16.vlgmr.msra.gmra.mxu1 %v4593_v32  ;;  %2813 = vmatpush1.bf16.msra.mxu0 %v4036_v33  ;;  %v4020_v32 = vcombine.low %v390_v37, %v394_v38  ;;  %v466_v33 = vld [vmem:[#allocation5 + $0xbb0] sm:$0xff]  ;;  %v3846_v37 = vcombine.low %v215_v25, %v219_v26  ;;  %v279_v26 = vld [vmem:[#allocation5 + $0x5d8] sm:$0xff] }
 0x148   :  { %2856 = vmatpush1.bf16.msra.mxu1 %v3782_v34  ;;  %2814 = vmatprep.subr.bf16.mxu0 %v4029_v35  ;;  %v207_v34 = vld [vmem:[#allocation5 + $0x398] sm:$0xff]  ;;  %v4093_v38 = vcombine.high %v462_v31, %v466_v33 }
 0x149   :  { %2857 = vmatprep.subr.bf16.mxu1 %v3775_v36  ;;  %2844 = vmatprep.mubr.bf16.mxu0 %v4607_v59  ;;  %v211_v35 = vld [vmem:[#allocation5 + $0x3b8] sm:$0xff]  ;;  %v4100_v36 = vcombine.low %v470_v23, %v474_v24 }
 0x14a   :  { %2887 = vmatprep.mubr.bf16.mxu1 %v4597_v12  ;;  %v3751_v12 = vcombine.high %v119_v53, %v123_v54  ;;  %v3839_v40 = vcombine.high %v207_v34, %v211_v35  ;;  %v3838_v45 = vcombine.low %v207_v34, %v211_v35  ;;  %v438_v54 = vld [vmem:[#allocation5 + $0xad0] sm:$0xff]  ;;  %v271_v35 = vld [vmem:[#allocation5 + $0x598] sm:$0xff] }
 0x14b   :  { %2815 = vmatpush1.bf16.msra.mxu0 %v4028_v42  ;;  %v458_v42 = vld [vmem:[#allocation5 + $0xb70] sm:$0xff] }
 0x14c   :  { %2858 = vmatpush1.bf16.msra.mxu1 %v3774_v16  ;;  %2816 = vmatprep.subr.bf16.mxu0 %v4021_v44  ;;  %v199_v16 = vld [vmem:[#allocation5 + $0x358] sm:$0xff]  ;;  %v4085_v46 = vcombine.high %v454_v41, %v458_v42 }
 0x14d   :  { %2859 = vmatprep.subr.bf16.mxu1 %v3767_v56  ;;  %v203_v44 = vld [vmem:[#allocation5 + $0x378] sm:$0xff]  ;;  %v4092_v56 = vcombine.low %v462_v31, %v466_v33 }
 0x14e   :  { %v3831_v47 = vcombine.high %v199_v16, %v203_v44  ;;  %v3830_v51 = vcombine.low %v199_v16, %v203_v44  ;;  %v263_v44 = vld [vmem:[#allocation5 + $0x558] sm:$0xff] }
 0x14f   :  { %2817 = vmatpush1.bf16.msra.mxu0 %v4020_v32  ;;  %v450_v32 = vld [vmem:[#allocation5 + $0xb30] sm:$0xff] }
 0x150   :  { %2860 = vmatpush1.bf16.msra.mxu1 %v3766_v48  ;;  %2818 = vmatprep.subr.bf16.mxu0 %v4013_v49  ;;  %v191_v48 = vld [vmem:[#allocation5 + $0x318] sm:$0xff]  ;;  %v4077_v52 = vcombine.high %v446_v22, %v450_v32 }
 0x151   :  { %2861 = vmatprep.subr.bf16.mxu1 %v3759_v50  ;;  %v195_v49 = vld [vmem:[#allocation5 + $0x338] sm:$0xff]  ;;  %v4084_v50 = vcombine.low %v454_v41, %v458_v42 }
 0x152   :  { %v3823_v53 = vcombine.high %v191_v48, %v195_v49  ;;  %v3822_v60 = vcombine.low %v191_v48, %v195_v49 }
 0x153   :  { %2819 = vmatpush1.bf16.msra.mxu0 %v4012_v55  ;;  %v442_v55 = vld [vmem:[#allocation5 + $0xaf0] sm:$0xff] }
 0x154   :  { %2862 = vmatpush1.bf16.msra.mxu1 %v3758_v57  ;;  %2820 = vmatprep.subr.bf16.mxu0 %v4005_v58  ;;  %v183_v57 = vld [vmem:[#allocation5 + $0x2d8] sm:$0xff]  ;;  %v4069_v61 = vcombine.high %v438_v54, %v442_v55 }
 0x155   :  { %2863 = vmatprep.subr.bf16.mxu1 %v3751_v12  ;;  %v187_v58 = vld [vmem:[#allocation5 + $0x2f8] sm:$0xff]  ;;  %v4076_v12 = vcombine.low %v446_v22, %v450_v32 }
 0x156   :  { %v3815_v62 = vcombine.high %v183_v57, %v187_v58  ;;  %v3814_v4 = vcombine.low %v183_v57, %v187_v58  ;;  %v247_v58 = vld [vmem:[#allocation5 + $0x4d8] sm:$0xff] }
 0x157   :  { %2821 = vmatpush1.bf16.msra.mxu0 %v4004_v0  ;;  %v434_v0 = vld [vmem:[#allocation5 + $0xab0] sm:$0xff] }
 0x158   :  { %2864 = vmatpush1.bf16.msra.mxu1 %v3750_v1  ;;  %2822 = vmatprep.subr.bf16.mxu0 %v3997_v2  ;;  %v175_v1 = vld [vmem:[#allocation5 + $0x298] sm:$0xff]  ;;  %v4061_v5 = vcombine.high %v430_v63, %v434_v0 }
 0x159   :  { %2865 = vmatprep.subr.bf16.mxu1 %v3743_v3  ;;  %v179_v2 = vld [vmem:[#allocation5 + $0x2b8] sm:$0xff]  ;;  %v4068_v3 = vcombine.low %v438_v54, %v442_v55 }
 0x15a   :  { %v3807_v6 = vcombine.high %v175_v1, %v179_v2  ;;  %v3806_v13 = vcombine.low %v175_v1, %v179_v2  ;;  %v243_v1 = vld [vmem:[#allocation5 + $0x4b8] sm:$0xff] }
 0x15b   :  { %2823 = vmatpush1.bf16.msra.mxu0 %v3996_v8  ;;  %v426_v8 = vld [vmem:[#allocation5 + $0xa70] sm:$0xff]  ;;  %v367_v2 = vld [vmem:[#allocation5 + $0x898] sm:$0xff] }
 0x15c   :  { %2866 = vmatpush1.bf16.msra.mxu1 %v3742_v9  ;;  %2824 = vmatprep.subr.bf16.mxu0 %v3989_v10  ;;  %v167_v9 = vld [vmem:[#allocation5 + $0x258] sm:$0xff]  ;;  %v4053_v14 = vcombine.high %v422_v7, %v426_v8 }
 0x15d   :  { %2867 = vmatprep.subr.bf16.mxu1 %v3735_v11  ;;  %v171_v10 = vld [vmem:[#allocation5 + $0x278] sm:$0xff]  ;;  %v4060_v11 = vcombine.low %v430_v63, %v434_v0 }
 0x15e   :  { %v3799_v15 = vcombine.high %v167_v9, %v171_v10  ;;  %v3798_v23 = vcombine.low %v167_v9, %v171_v10  ;;  %v239_v0 = vld [vmem:[#allocation5 + $0x498] sm:$0xff] }
 0x15f   :  { %2825 = vmatpush1.bf16.msra.mxu0 %v3988_v18  ;;  %v418_v18 = vld [vmem:[#allocation5 + $0xa30] sm:$0xff]  ;;  %v231_v9 = vld [vmem:[#allocation5 + $0x458] sm:$0xff] }
 0x160   :  { %2868 = vmatpush1.bf16.msra.mxu1 %v3734_v19  ;;  %2826 = vmatprep.subr.bf16.mxu0 %v3981_v20  ;;  %v159_v19 = vld [vmem:[#allocation5 + $0x218] sm:$0xff]  ;;  %v4045_v24 = vcombine.high %v414_v17, %v418_v18 }
 0x161   :  { %2869 = vmatprep.subr.bf16.mxu1 %v3727_v21  ;;  %v163_v20 = vld [vmem:[#allocation5 + $0x238] sm:$0xff]  ;;  %v4052_v21 = vcombine.low %v422_v7, %v426_v8  ;;  %v4617_v7 = vpop.f32.mrf.mxu0 }
 0x162   :  { %v3791_v25 = vcombine.high %v159_v19, %v163_v20  ;;  %v3790_v31 = vcombine.low %v159_v19, %v163_v20  ;;  %v235_v10 = vld [vmem:[#allocation5 + $0x478] sm:$0xff] }
 0x163   :  { %2827 = vmatpush1.bf16.msra.mxu0 %v3980_v27  ;;  %v283_v27 = vld [vmem:[#allocation5 + $0x5f8] sm:$0xff] }
 0x164   :  { %2870 = vmatpush1.bf16.msra.mxu1 %v3726_v28  ;;  %2828 = vmatprep.subr.bf16.mxu0 %v4101_v29  ;;  %v407_v28 = vld [vmem:[#allocation5 + $0x9d8] sm:$0xff]  ;;  %v3911_v33 = vcombine.high %v279_v26, %v283_v27 }
 0x165   :  { %2871 = vmatprep.subr.bf16.mxu1 %v3847_v30  ;;  %v411_v29 = vld [vmem:[#allocation5 + $0x9f8] sm:$0xff]  ;;  %v4044_v30 = vcombine.low %v414_v17, %v418_v18  ;;  %v3863_v17 = vcombine.high %v231_v9, %v235_v10  ;;  %v4619_v18 = vpop.f32.mrf.mxu0 }
 0x166   :  { %v4039_v34 = vcombine.high %v407_v28, %v411_v29  ;;  %v4038_v41 = vcombine.low %v407_v28, %v411_v29  ;;  %v223_v20 = vld [vmem:[#allocation5 + $0x418] sm:$0xff] }
 0x167   :  { %2829 = vmatpush2.bf16.msra.mxu0 %v4100_v36  ;;  %v275_v36 = vld [vmem:[#allocation5 + $0x5b8] sm:$0xff]  ;;  %v4621_v28 = vpop.f32.mrf.mxu0 }
 0x168   :  { %2872 = vmatpush2.bf16.msra.mxu1 %v3846_v37  ;;  %2830 = vmatprep.subr.bf16.mxu0 %v4093_v38  ;;  %v399_v37 = vld [vmem:[#allocation5 + $0x998] sm:$0xff]  ;;  %v3903_v42 = vcombine.high %v271_v35, %v275_v36  ;;  %v3902_v22 = vcombine.low %v271_v35, %v275_v36 }
 0x169   :  { %2873 = vmatprep.subr.bf16.mxu1 %v3839_v40  ;;  %v403_v38 = vld [vmem:[#allocation5 + $0x9b8] sm:$0xff]  ;;  %v3910_v40 = vcombine.low %v279_v26, %v283_v27 }
 0x16a   :  { %v4031_v16 = vcombine.high %v399_v37, %v403_v38  ;;  %v4030_v32 = vcombine.low %v399_v37, %v403_v38  ;;  %v475_v35 = vld [vmem:[#allocation5 + $0xbf8] sm:$0xff] }
 0x16b   :  { %2831 = vmatpush2.bf16.msra.mxu0 %v4092_v56  ;;  %v267_v56 = vld [vmem:[#allocation5 + $0x578] sm:$0xff] }
 0x16c   :  { %2874 = vmatpush2.bf16.msra.mxu1 %v3838_v45  ;;  %2832 = vmatprep.subr.bf16.mxu0 %v4085_v46  ;;  %v4611_v45 = vld [vmem:[#allocation2 + $0x10] ss:$24 sps:$4 sm:$0xff]   ;;  %v3895_v48 = vcombine.high %v263_v44, %v267_v56  ;;  %v3894_v54 = vcombine.low %v263_v44, %v267_v56 }
 0x16d   :  { %2875 = vmatprep.subr.bf16.mxu1 %v3831_v47  ;;  %v391_v46 = vld [vmem:[#allocation5 + $0x958] sm:$0xff] }
 0x16e   :  { %v395_v47 = vld [vmem:[#allocation5 + $0x978] sm:$0xff] }
 0x16f   :  { %2833 = vmatpush2.bf16.msra.mxu0 %v4084_v50  ;;  %v4023_v49 = vcombine.high %v391_v46, %v395_v47  ;;  %v255_v50 = vld [vmem:[#allocation5 + $0x518] sm:$0xff] }
 0x170   :  { %2876 = vmatpush2.bf16.msra.mxu1 %v3830_v51  ;;  %2834 = vmatprep.subr.bf16.mxu0 %v4077_v52  ;;  %v259_v51 = vld [vmem:[#allocation5 + $0x538] sm:$0xff] }
 0x171   :  { %2877 = vmatprep.subr.bf16.mxu1 %v3823_v53  ;;  %v383_v52 = vld [vmem:[#allocation5 + $0x918] sm:$0xff]  ;;  %v3887_v55 = vcombine.high %v255_v50, %v259_v51 }
 0x172   :  { %v387_v53 = vld [vmem:[#allocation5 + $0x938] sm:$0xff] }
 0x173   :  { %2835 = vmatpush2.bf16.msra.mxu0 %v4076_v12  ;;  %v4015_v57 = vcombine.high %v383_v52, %v387_v53  ;;  %v251_v12 = vld [vmem:[#allocation5 + $0x4f8] sm:$0xff] }
 0x174   :  { %2878 = vmatpush2.bf16.msra.mxu1 %v3822_v60  ;;  %2836 = vmatprep.subr.bf16.mxu0 %v4069_v61  ;;  %v375_v60 = vld [vmem:[#allocation5 + $0x8d8] sm:$0xff]  ;;  %v3879_v63 = vcombine.high %v247_v58, %v251_v12 }
 0x175   :  { %2879 = vmatprep.subr.bf16.mxu1 %v3815_v62  ;;  %v379_v61 = vld [vmem:[#allocation5 + $0x8f8] sm:$0xff]  ;;  %v3886_v62 = vcombine.low %v255_v50, %v259_v51 }
 0x176   :  { %v463_v56 = vld [vmem:[#allocation5 + $0xb98] sm:$0xff] }
 0x177   :  { %2837 = vmatpush2.bf16.msra.mxu0 %v4068_v3  ;;  %v371_v3 = vld [vmem:[#allocation5 + $0x8b8] sm:$0xff] }
 0x178   :  { %2880 = vmatpush2.bf16.msra.mxu1 %v3814_v4  ;;  %2838 = vmatprep.subr.bf16.mxu0 %v4061_v5  ;;  %v3878_v4 = vcombine.low %v247_v58, %v251_v12  ;;  %v4006_v5 = vcombine.low %v375_v60, %v379_v61  ;;  %v3999_v8 = vcombine.high %v367_v2, %v371_v3  ;;  %v327_v51 = vld [vmem:[#allocation5 + $0x758] sm:$0xff] }
 0x179   :  { %2881 = vmatprep.subr.bf16.mxu1 %v3807_v6  ;;  %v3871_v6 = vcombine.high %v239_v0, %v243_v1 }
 0x17b   :  { %2839 = vmatpush2.bf16.msra.mxu0 %v4060_v11  ;;  %v359_v11 = vld [vmem:[#allocation5 + $0x858] sm:$0xff] }
 0x17c   :  { %2882 = vmatpush2.bf16.msra.mxu1 %v3806_v13  ;;  %2840 = vmatprep.subr.bf16.mxu0 %v4053_v14  ;;  %v363_v13 = vld [vmem:[#allocation5 + $0x878] sm:$0xff]  ;;  %v3870_v14 = vcombine.low %v239_v0, %v243_v1 }
 0x17d   :  { %2883 = vmatprep.subr.bf16.mxu1 %v3799_v15  ;;  %v3998_v15 = vcombine.low %v367_v2, %v371_v3  ;;  %v3991_v19 = vcombine.high %v359_v11, %v363_v13  ;;  %v3990_v26 = vcombine.low %v359_v11, %v363_v13  ;;  %v447_v0 = vld [vmem:[#allocation5 + $0xb18] sm:$0xff] }
 0x17e   :  { %v451_v1 = vld [vmem:[#allocation5 + $0xb38] sm:$0xff] }
 0x17f   :  { %2841 = vmatpush2.bf16.msra.mxu0 %v4052_v21  ;;  %v227_v21 = vld [vmem:[#allocation5 + $0x438] sm:$0xff] }
 0x180   :  { %2884 = vmatpush2.bf16.msra.mxu1 %v3798_v23  ;;  %2842 = vmatprep.subr.bf16.mxu0 %v4045_v24  ;;  %v351_v23 = vld [vmem:[#allocation5 + $0x818] sm:$0xff]  ;;  %v3855_v27 = vcombine.high %v223_v20, %v227_v21  ;;  %v3854_v36 = vcombine.low %v223_v20, %v227_v21 }
 0x181   :  { %2885 = vmatprep.subr.bf16.mxu1 %v3791_v25  ;;  %v355_v24 = vld [vmem:[#allocation5 + $0x838] sm:$0xff]  ;;  %v3862_v25 = vcombine.low %v231_v9, %v235_v10  ;;  %v4079_v9 = vcombine.high %v447_v0, %v451_v1 }
 0x182   :  { %v3983_v29 = vcombine.high %v351_v23, %v355_v24  ;;  %v3982_v37 = vcombine.low %v351_v23, %v355_v24  ;;  %v311_v10 = vld [vmem:[#allocation5 + $0x6d8] sm:$0xff]  ;;  %v4078_v23 = vcombine.low %v447_v0, %v451_v1 }
 0x183   :  { %2843 = vmatpush2.bf16.msra.mxu0 %v4044_v30  ;;  %v343_v30 = vld [vmem:[#allocation5 + $0x7d8] sm:$0xff] }
 0x184   :  { %2886 = vmatpush2.bf16.msra.mxu1 %v3790_v31  ;;  %2898 = vmatprep.subr.bf16.mxu0 %v3911_v33  ;;  %v347_v31 = vld [vmem:[#allocation5 + $0x7f8] sm:$0xff]  ;;  %v478_v33 = vlaneseq }
 0x185   :  { %2941 = vmatprep.subr.bf16.mxu1 %v4039_v34  ;;  %v471_v34 = vld [vmem:[#allocation5 + $0xbd8] sm:$0xff]  ;;  %v3975_v38 = vcombine.high %v343_v30, %v347_v31 }
 0x186   :  { %2845 = vmatmul.mubr.bf16.vlgmr.msra.gmra.mxu0 %v4611_v45  ;;  %v4623_v44 = vshrl.u32 %v478_v33, 7  ;;  %v315_v11 = vld [vmem:[#allocation5 + $0x6f8] sm:$0xff] }
 0x187   :  { %2888 = vmatmul.mubr.bf16.vlgmr.msra.gmra.mxu1 %v4603_v39  ;;  %2899 = vmatpush1.bf16.msra.mxu0 %v3910_v40  ;;  %v4022_v39 = vcombine.low %v391_v46, %v395_v47  ;;  %v2508_v40 = vpop.f32.mrf.mxu0  ;;  %v467_v46 = vld [vmem:[#allocation5 + $0xbb8] sm:$0xff]  ;;  %v4625_v47 = vpop.f32.mrf.mxu1  ;;  %v3943_v24 = vcombine.high %v311_v10, %v315_v11 }
 0x188   :  { %2942 = vmatpush1.bf16.msra.mxu1 %v4038_v41  ;;  %2900 = vmatprep.subr.bf16.mxu0 %v3903_v42  ;;  %v4103_v41 = vcombine.high %v471_v34, %v475_v35  ;;  %v335_v42 = vld [vmem:[#allocation5 + $0x798] sm:$0xff]  ;;  %v4095_v50 = vcombine.high %v463_v56, %v467_v46  ;;  %v488_v0 = vsub.s32 2, %v4623_v44 }
 0x189   :  { %2943 = vmatprep.subr.bf16.mxu1 %v4031_v16  ;;  %2930 = vmatprep.mubr.bf16.mxu0 %v4600_v43  ;;  %v4014_v43 = vcombine.low %v383_v52, %v387_v53  ;;  %v339_v16 = vld [vmem:[#allocation5 + $0x7b8] sm:$0xff]  ;;  %v484_v53 = vsub.s32 1, %v4623_v44 }
 0x18a   :  { %2973 = vmatprep.mubr.bf16.mxu1 %v4607_v59  ;;  %v4007_v59 = vcombine.high %v375_v60, %v379_v61  ;;  %v331_v52 = vld [vmem:[#allocation5 + $0x778] sm:$0xff]  ;;  %v3966_v12 = vcombine.low %v335_v42, %v339_v16  ;;  %v4094_v60 = vcombine.low %v463_v56, %v467_v46 }
 0x18b   :  { %2901 = vmatpush1.bf16.msra.mxu0 %v3902_v22  ;;  %v4627_v22 = vpop.f32.mrf.mxu0  ;;  %v3959_v61 = vcombine.high %v327_v51, %v331_v52  ;;  %v435_v33 = vld [vmem:[#allocation5 + $0xab8] sm:$0xff] }
 0x18c   :  { %2944 = vmatpush1.bf16.msra.mxu1 %v4030_v32  ;;  %2902 = vmatprep.subr.bf16.mxu0 %v3895_v48  ;;  %v3974_v32 = vcombine.low %v343_v30, %v347_v31  ;;  %v4102_v48 = vcombine.low %v471_v34, %v475_v35  ;;  %v431_v31 = vld [vmem:[#allocation5 + $0xa98] sm:$0xff] }
 0x18d   :  { %2945 = vmatprep.subr.bf16.mxu1 %v4023_v49  ;;  %v3967_v49 = vcombine.high %v335_v42, %v339_v16  ;;  %v2590_v58 = vpop.f32.mrf.mxu0  ;;  %v427_v42 = vld [vmem:[#allocation5 + $0xa78] sm:$0xff]  ;;  %v4062_v56 = vcombine.low %v431_v31, %v435_v33 }
 0x18f   :  { %2903 = vmatpush1.bf16.msra.mxu0 %v3894_v54  ;;  %v455_v54 = vld [vmem:[#allocation5 + $0xb58] sm:$0xff]  ;;  %v4635_v3 = vpop.f32.mrf.mxu0 }
 0x190   :  { %2946 = vmatpush1.bf16.msra.mxu1 %v4022_v39  ;;  %2904 = vmatprep.subr.bf16.mxu0 %v3887_v55  ;;  %v459_v39 = vld [vmem:[#allocation5 + $0xb78] sm:$0xff]  ;;  %v4630_v55 = vld [vmem:[#allocation7] sm:$0xff] }
 0x191   :  { %2947 = vmatprep.subr.bf16.mxu1 %v4015_v57  ;;  %v2547_v57 = vpop.f32.mrf.mxu1 }
 0x193   :  { %2905 = vmatpush1.bf16.msra.mxu0 %v3886_v62  ;;  %v4087_v62 = vcombine.high %v455_v54, %v459_v39  ;;  %v4633_v2 = vpop.f32.mrf.mxu1 }
 0x194   :  { %2948 = vmatpush1.bf16.msra.mxu1 %v4014_v43  ;;  %2906 = vmatprep.subr.bf16.mxu0 %v3879_v63  ;;  %v319_v43 = vld [vmem:[#allocation5 + $0x718] sm:$0xff] }
 0x195   :  { %2949 = vmatprep.subr.bf16.mxu1 %v4007_v59  ;;  %v323_v63 = vld [vmem:[#allocation5 + $0x738] sm:$0xff]  ;;  %v485_v59 = vrot.slane %v4630_v55, %v484_v53 }
 0x196   :  { %v3950_v20 = vcombine.low %v319_v43, %v323_v63 }
 0x197   :  { %2907 = vmatpush1.bf16.msra.mxu0 %v3878_v4  ;;  %v3958_v4 = vcombine.low %v327_v51, %v331_v52  ;;  %v2505_v13 = vadd.f32 %v4619_v18, %v485_v59  ;;  %v3942_v18 = vcombine.low %v311_v10, %v315_v11  ;;  %v415_v51 = vld [vmem:[#allocation5 + $0xa18] sm:$0xff] }
 0x198   :  { %2950 = vmatpush1.bf16.msra.mxu1 %v4006_v5  ;;  %2908 = vmatprep.subr.bf16.mxu0 %v3871_v6  ;;  %v2509_v5 = vadd.f32 %v2508_v40, %v485_v59  ;;  %v4086_v6 = vcombine.low %v455_v54, %v459_v39  ;;  %v299_v40 = vld [vmem:[#allocation5 + $0x678] sm:$0xff] }
 0x199   :  { %2951 = vmatprep.subr.bf16.mxu1 %v3999_v8  ;;  %v3951_v8 = vcombine.high %v319_v43, %v323_v63  ;;  %v419_v52 = vld [vmem:[#allocation5 + $0xa38] sm:$0xff]  ;;  %v4281_v63 = vld [vmem:[#allocation8 + $0xf8] sm:$0xff]  }
 0x19a   :  { %v4284_v10 = vld [vmem:[#allocation8 + $0x70] sm:$0xff]  }
 0x19b   :  { %2909 = vmatpush1.bf16.msra.mxu0 %v3870_v14  ;;  %v439_v14 = vld [vmem:[#allocation5 + $0xad8] sm:$0xff] }
 0x19c   :  { %2952 = vmatpush1.bf16.msra.mxu1 %v3998_v15  ;;  %2910 = vmatprep.subr.bf16.mxu0 %v3863_v17  ;;  %v443_v15 = vld [vmem:[#allocation5 + $0xaf8] sm:$0xff]  ;;  %v2551_v17 = vpop.f32.mrf.mxu1 }
 0x19d   :  { %2953 = vmatprep.subr.bf16.mxu1 %v3991_v19  ;;  %v2594_v19 = vpop.f32.mrf.mxu0  ;;  %v2552_v21 = vadd.f32 %v2551_v17, %v2509_v5  ;;  %v4070_v35 = vcombine.low %v439_v14, %v443_v15  ;;  %v480_v5 = vsub.s32 0, %v4623_v44  ;;  %v4285_v11 = vld [vmem:[#allocation8 + $0xf0] sm:$0xff]   ;;  %v489_v17 = vrot.slane %v4630_v55, %v488_v0 }
 0x19f   :  { %2911 = vmatpush1.bf16.msra.mxu0 %v3862_v25  ;;  %v4071_v25 = vcombine.high %v439_v14, %v443_v15  ;;  %v2595_v30 = vadd.f32 %v2594_v19, %v2552_v21  ;;  %v4386_v14 = vld [vmem:[#allocation2 + $0x8] ss:$24 sps:$4 sm:$0xff]  }
 0x1a0   :  { %2954 = vmatpush1.bf16.msra.mxu1 %v3990_v26  ;;  %2912 = vmatprep.subr.bf16.mxu0 %v3855_v27  ;;  %v303_v26 = vld [vmem:[#allocation5 + $0x698] sm:$0xff] }
 0x1a1   :  { %2955 = vmatprep.subr.bf16.mxu1 %v3983_v29  ;;  %v307_v27 = vld [vmem:[#allocation5 + $0x6b8] sm:$0xff]  ;;  %v2548_v29 = vadd.f32 %v2547_v57, %v2505_v13  ;;  %4344 = vtanh.f32 %v2595_v30  ;;  %v4289_v30 = vld [vmem:[#allocation8 + $0xe8] sm:$0xff]  }
 0x1a2   :  { %v3934_v16 = vcombine.low %v303_v26, %v307_v27  ;;  %v4286_v21 = vld [vmem:[#allocation8 + $0x30] sm:$0xff]  }
 0x1a3   :  { %2913 = vmatpush1.bf16.msra.mxu0 %v3854_v36  ;;  %v2591_v34 = vadd.f32 %v2590_v58, %v2548_v29  ;;  %v3935_v36 = vcombine.high %v303_v26, %v307_v27  ;;  %v4047_v58 = vcombine.high %v415_v51, %v419_v52  ;;  %v4288_v26 = vld [vmem:[#allocation8 + $0x68] sm:$0xff]  }
 0x1a4   :  { %2956 = vmatpush1.bf16.msra.mxu1 %v3982_v37  ;;  %2914 = vmatprep.subr.bf16.mxu0 %v3975_v38  ;;  %v4063_v37 = vcombine.high %v431_v31, %v435_v33  ;;  %v295_v38 = vld [vmem:[#allocation5 + $0x658] sm:$0xff] }
 0x1a5   :  { %2957 = vmatprep.subr.bf16.mxu1 %v4103_v41  ;;  %v423_v41 = vld [vmem:[#allocation5 + $0xa58] sm:$0xff]  ;;  %4346 = vtanh.f32 %v2591_v34  ;;  %v3927_v46 = vcombine.high %v295_v38, %v299_v40  ;;  %v3926_v53 = vcombine.low %v295_v38, %v299_v40  ;;  %v4291_v40 = vld [vmem:[#allocation8 + $0xa8] sm:$0xff]  }
 0x1a6   :  { %v4054_v54 = vcombine.low %v423_v41, %v427_v42 }
 0x1a7   :  { %2915 = vmatpush2.bf16.msra.mxu0 %v3974_v32  ;;  %v4638_v32 = vpop.f32.mrf.mxu1 }
 0x1a8   :  { %2958 = vmatpush2.bf16.msra.mxu1 %v4102_v48  ;;  %2916 = vmatprep.subr.bf16.mxu0 %v3967_v49  ;;  %v4055_v48 = vcombine.high %v423_v41, %v427_v42  ;;  %v287_v49 = vld [vmem:[#allocation5 + $0x618] sm:$0xff]  ;;  %v4292_v41 = vld [vmem:[#allocation8 + $0x60] sm:$0xff]   ;;  %v2632_v42 = vadd.f32 %v4638_v32, %v489_v17  ;;  %v4296_v32 = vld [vmem:[#allocation8 + $0x58] sm:$0xff]  }
 0x1a9   :  { %2959 = vmatprep.subr.bf16.mxu1 %v4095_v50  ;;  %v291_v50 = vld [vmem:[#allocation5 + $0x638] sm:$0xff]  ;;  %v2633_v57 = vpop.f32.mrf.mxu1 }
 0x1aa   :  { %v3919_v39 = vcombine.high %v287_v49, %v291_v50 }
 0x1ab   :  { %2917 = vmatpush2.bf16.msra.mxu0 %v3966_v12  ;;  %v492_v12 = vsub.s32 3, %v4623_v44  ;;  %v2635_v43 = vpop.f32.mrf.mxu1 }
 0x1ac   :  { %2960 = vmatpush2.bf16.msra.mxu1 %v4094_v60  ;;  %2918 = vmatprep.subr.bf16.mxu0 %v3959_v61  ;;  %v3918_v60 = vcombine.low %v287_v49, %v291_v50  ;;  %v4046_v61 = vcombine.low %v415_v51, %v419_v52  ;;  %v4294_v51 = vld [vmem:[#allocation8 + $0x20] sm:$0xff]  }
 0x1ad   :  { %2961 = vmatprep.subr.bf16.mxu1 %v4087_v62  ;;  %v4280_v62 = vld [vmem:[#allocation8 + $0x78] sm:$0xff]   ;;  %v493_v1 = vrot.slane %v4630_v55, %v492_v12  ;;  %v4300_v12 = vld [vmem:[#allocation8 + $0x50] sm:$0xff]  }
 0x1ae   :  { %v4345_v59 = vpop.eup %4344 }
 0x1af   :  { %2919 = vmatpush2.bf16.msra.mxu0 %v3958_v4  ;;  %v4282_v4 = vld [vmem:[#allocation8 + $0x38] sm:$0xff]   ;;  %v2634_v19 = vadd.f32 %v2633_v57, %v493_v1 }
 0x1b0   :  { %2962 = vmatpush2.bf16.msra.mxu1 %v4086_v6  ;;  %2920 = vmatprep.subr.bf16.mxu0 %v3951_v8  ;;  %v4283_v6 = vld [vmem:[#allocation8 + $0xb8] sm:$0xff]  }
 0x1b1   :  { %2963 = vmatprep.subr.bf16.mxu1 %v4079_v9  ;;  %v2637_v9 = vpop.f32.mrf.mxu1 }
 0x1b2   :  { %v4347_v8 = vpop.eup %4346  ;;  %v2638_v34 = vadd.f32 %v2637_v9, %v493_v1  ;;  %v4309_v1 = vld [vmem:[#allocation8 + $0xc0] sm:$0xff]   ;;  %v4312_v9 = vld [vmem:[#allocation8 + $0x178] sm:$0xff]  }
 0x1b3   :  { %2921 = vmatpush2.bf16.msra.mxu0 %v3950_v20  ;;  %v3001_v15 = vpack.c.bf16 %v4345_v59, %v4347_v8  ;;  %v4308_v59 = vld [vmem:[#allocation8 + $0x40] sm:$0xff]  }
 0x1b4   :  { %2964 = vmatpush2.bf16.msra.mxu1 %v4078_v23  ;;  %2922 = vmatprep.subr.bf16.mxu0 %v3943_v24  ;;  %v481_v23 = vrot.slane %v4630_v55, %v480_v5  ;;  %v4311_v8 = vld [vmem:[#allocation8 + $0x80] sm:$0xff]  }
 0x1b5   :  { %2965 = vmatprep.subr.bf16.mxu1 %v4071_v25  ;;  %v4287_v25 = vld [vmem:[#allocation8 + $0xb0] sm:$0xff]  }
 0x1b6   :  { %v2507_v31 = vadd.f32 %v4621_v28, %v481_v23  ;;  %v4293_v28 = vld [vmem:[#allocation8 + $0xe0] sm:$0xff]  }
 0x1b7   :  { %2923 = vmatpush2.bf16.msra.mxu0 %v3942_v18  ;;  %v2636_v18 = vadd.f32 %v2635_v43, %v489_v17  ;;  %v4306_v43 = vld [vmem:[#allocation8 + $0x8] sm:$0xff]  }
 0x1b8   :  { %2966 = vmatpush2.bf16.msra.mxu1 %v4070_v35  ;;  %2924 = vmatprep.subr.bf16.mxu0 %v3935_v36  ;;  %v4290_v35 = vld [vmem:[#allocation8 + $0x28] sm:$0xff]   ;;  %v2503_v36 = vadd.f32 %v4617_v7, %v481_v23 }
 0x1b9   :  { %2967 = vmatprep.subr.bf16.mxu1 %v4063_v37 }
 0x1ba   :  { %v2546_v7 = vadd.f32 %v4625_v47, %v2503_v36  ;;  %v4299_v47 = vld [vmem:[#allocation8 + $0x98] sm:$0xff]   ;;  %v4327_v36 = vld [vmem:[#allocation8 + $0x100] sm:$0xff]  }
 0x1bb   :  { %2925 = vmatpush2.bf16.msra.mxu0 %v3934_v16 }
 0x1bc   :  { %2968 = vmatpush2.bf16.msra.mxu1 %v4062_v56  ;;  %2926 = vmatprep.subr.bf16.mxu0 %v3927_v46  ;;  %v2550_v46 = vadd.f32 %v4633_v2, %v2507_v31  ;;  %v2589_v2 = vadd.f32 %v4627_v22, %v2546_v7  ;;  %v4305_v22 = vld [vmem:[#allocation8 + $0xc8] sm:$0xff]   ;;  %v4321_v31 = vld [vmem:[#allocation8 + $0x118] sm:$0xff]   ;;  %v4343_v7 = vld [vmem:[#allocation8 + $0x180] sm:$0xff]  }
 0x1bd   :  { %2969 = vmatprep.subr.bf16.mxu1 %v4055_v48 }
 0x1be   :  { %v2593_v52 = vadd.f32 %v4635_v3, %v2550_v46  ;;  %v4301_v3 = vld [vmem:[#allocation8 + $0xd0] sm:$0xff]  }
 0x1bf   :  { %2927 = vmatpush2.bf16.msra.mxu0 %v3926_v53  ;;  %v4295_v53 = vld [vmem:[#allocation8 + $0xa0] sm:$0xff]   ;;  %v4338_v46 = vld [vmem:[#allocation8 + $0x1d0] sm:$0xff]  }
 0x1c0   :  { %2970 = vmatpush2.bf16.msra.mxu1 %v4054_v54  ;;  %2928 = vmatprep.subr.bf16.mxu0 %v3919_v39  ;;  %v4297_v39 = vld [vmem:[#allocation8 + $0xd8] sm:$0xff]  }
 0x1c1   :  { %2971 = vmatprep.subr.bf16.mxu1 %v4047_v58  ;;  %v4298_v58 = vld [vmem:[#allocation8 + $0x18] sm:$0xff]  }
 0x1c3   :  { %2929 = vmatpush2.bf16.msra.mxu0 %v3918_v60  ;;  %v4302_v60 = vld [vmem:[#allocation8 + $0x10] sm:$0xff]  }
 0x1c4   :  { %2972 = vmatpush2.bf16.msra.mxu1 %v4046_v61  ;;  %4169 = vmatprep.subr.bf16.mxu0 %v4280_v62  ;;  %v4303_v61 = vld [vmem:[#allocation8 + $0x90] sm:$0xff]   ;;  %v4304_v62 = vld [vmem:[#allocation8 + $0x48] sm:$0xff]  }
 0x1c5   :  { %4191 = vmatprep.subr.bf16.mxu1 %v4281_v63  ;;  %v4307_v63 = vld [vmem:[#allocation8 + $0x88] sm:$0xff]  }
 0x1c6   :  { %v2674_v13 = vpop.f32.mrf.mxu0  ;;  %2931 = vmatmul.mubr.bf16.vlgmr.msra.gmra.mxu0 %v4386_v14 }
 0x1c7   :  { %v2717_v20 = vpop.f32.mrf.mxu1  ;;  %2974 = vmatmul.mubr.bf16.vlgmr.msra.gmra.mxu1 %v4611_v45  ;;  %4170 = vmatpush3.bf16.msra.mxu0 %v4282_v4  ;;  %v2675_v49 = vadd.f32 %v2674_v13, %v2632_v42  ;;  %v4334_v42 = vld [vmem:[#allocation8 + $0x1e0] sm:$0xff]  }
 0x1c8   :  { %3559 = vmatprep.mubr.bf16.mxu0 %v3001_v15  ;;  %4192 = vmatpush3.bf16.msra.mxu1 %v4283_v6  ;;  %v2676_v24 = vpop.f32.mrf.mxu0  ;;  %v4310_v6 = vld [vmem:[#allocation8] sm:$0xff]   ;;  %v4313_v15 = vld [vmem:[#allocation8 + $0x138] sm:$0xff]  }
 0x1c9   :  { %v2677_v27 = vadd.f32 %v2676_v24, %v2634_v19  ;;  %v2719_v29 = vpop.f32.mrf.mxu1  ;;  %4171 = vmatprep.subr.bf16.mxu0 %v4284_v10  ;;  %4193 = vmatprep.subr.bf16.mxu1 %v4285_v11  ;;  %v2718_v57 = vadd.f32 %v2717_v20, %v2675_v49  ;;  %v4328_v11 = vld [vmem:[#allocation8 + $0x1f8] sm:$0xff]   ;;  %v4314_v20 = vld [vmem:[#allocation8 + $0x170] sm:$0xff]   ;;  %v4340_v49 = vld [vmem:[#allocation8 + $0x1c8] sm:$0xff]  }
 0x1ca   :  { %v2678_v33 = vpop.f32.mrf.mxu0  ;;  %v4315_v24 = vld [vmem:[#allocation8 + $0x130] sm:$0xff]  }
 0x1cb   :  { %v2721_v45 = vpop.f32.mrf.mxu1  ;;  %4172 = vmatpush3.bf16.msra.mxu0 %v4286_v21  ;;  %v2720_v37 = vadd.f32 %v2719_v29, %v2677_v27  ;;  %v2679_v16 = vadd.f32 %v2678_v33, %v2636_v18  ;;  %v4329_v21 = vld [vmem:[#allocation8 + $0x1b8] sm:$0xff]   ;;  %v4318_v27 = vld [vmem:[#allocation8 + $0x160] sm:$0xff]   ;;  %v4322_v33 = vld [vmem:[#allocation8 + $0x150] sm:$0xff]  }
 0x1cc   :  { %4194 = vmatpush3.bf16.msra.mxu1 %v4287_v25  ;;  %v2680_v38 = vpop.f32.mrf.mxu0  ;;  %4173 = vmatprep.subr.bf16.mxu0 %v4288_v26  ;;  %v4316_v25 = vld [vmem:[#allocation8 + $0x168] sm:$0xff]   ;;  %v4319_v29 = vld [vmem:[#allocation8 + $0x120] sm:$0xff]   ;;  %v4323_v18 = vld [vmem:[#allocation8 + $0x110] sm:$0xff]  }
 0x1cd   :  { %v2681_v56 = vadd.f32 %v2680_v38, %v2638_v34  ;;  %4195 = vmatprep.subr.bf16.mxu1 %v4289_v30  ;;  %v2723_v48 = vpop.f32.mrf.mxu1  ;;  %4348 = vtanh.f32 %v2720_v37  ;;  %v2722_v54 = vadd.f32 %v2721_v45, %v2679_v16  ;;  %v4317_v26 = vld [vmem:[#allocation8 + $0x128] sm:$0xff]   ;;  %v4320_v30 = vld [vmem:[#allocation8 + $0x158] sm:$0xff]   ;;  %v4330_v37 = vld [vmem:[#allocation8 + $0x1f0] sm:$0xff]  }
 0x1ce   :  { %v4324_v34 = vld [vmem:[#allocation8 + $0x148] sm:$0xff]   ;;  %v4331_v38 = vld [vmem:[#allocation8 + $0x1b0] sm:$0xff]   ;;  %v4335_v16 = vld [vmem:[#allocation8 + $0x1a0] sm:$0xff]  }
 0x1cf   :  { %v2724_v50 = vadd.f32 %v2723_v48, %v2681_v56  ;;  %4174 = vmatpush3.bf16.msra.mxu0 %v4290_v35  ;;  %v4325_v45 = vld [vmem:[#allocation8 + $0x108] sm:$0xff]   ;;  %v4326_v35 = vld [vmem:[#allocation8 + $0x140] sm:$0xff]   ;;  %v4336_v56 = vld [vmem:[#allocation8 + $0x1d8] sm:$0xff]  }
 0x1d0   :  { %4196 = vmatpush3.bf16.msra.mxu1 %v4291_v40  ;;  %4175 = vmatprep.subr.bf16.mxu0 %v4292_v41  ;;  %v4332_v40 = vld [vmem:[#allocation8 + $0x1e8] sm:$0xff]   ;;  %v4339_v48 = vld [vmem:[#allocation8 + $0x190] sm:$0xff]  }
 0x1d1   :  { %4350 = vtanh.f32 %v2724_v50  ;;  %4197 = vmatprep.subr.bf16.mxu1 %v4293_v28  ;;  %v4333_v41 = vld [vmem:[#allocation8 + $0x1a8] sm:$0xff]   ;;  %v4337_v28 = vld [vmem:[#allocation8 + $0x198] sm:$0xff]  }
 0x1d2   :  { %4352 = vtanh.f32 %v2593_v52  ;;  %v4341_v50 = vld [vmem:[#allocation8 + $0x188] sm:$0xff]  }
 0x1d3   :  { %4176 = vmatpush3.bf16.msra.mxu0 %v4294_v51  ;;  %4354 = vtanh.f32 %v2722_v54  ;;  %v4342_v51 = vld [vmem:[#allocation8 + $0x1c0] sm:$0xff]   ;;  %v496_v54 = vsub.s32 4, %v4623_v44 }
 0x1d4   :  { %4198 = vmatpush3.bf16.msra.mxu1 %v4295_v53  ;;  %4177 = vmatprep.subr.bf16.mxu0 %v4296_v32  ;;  %4356 = vtanh.f32 %v2589_v2  ;;  %v500_v53 = vsub.s32 5, %v4623_v44 }
 0x1d5   :  { %4199 = vmatprep.subr.bf16.mxu1 %v4297_v39  ;;  %4358 = vtanh.f32 %v2718_v57 }
 0x1d6   :  { %v501_v2 = vrot.slane %v4630_v55, %v500_v53 }
 0x1d7   :  { %4178 = vmatpush3.bf16.msra.mxu0 %v4298_v58  ;;  %v497_v58 = vrot.slane %v4630_v55, %v496_v54 }
 0x1d8   :  { %4200 = vmatpush3.bf16.msra.mxu1 %v4299_v47  ;;  %4179 = vmatprep.subr.bf16.mxu0 %v4300_v12 }
 0x1d9   :  { %4201 = vmatprep.subr.bf16.mxu1 %v4301_v3 }
 0x1da   :  { %v4349_v0 = vpop.eup %4348 }
 0x1db   :  { %4180 = vmatpush3.bf16.msra.mxu0 %v4302_v60 }
 0x1dc   :  { %4202 = vmatpush3.bf16.msra.mxu1 %v4303_v61  ;;  %4181 = vmatprep.subr.bf16.mxu0 %v4304_v62 }
 0x1dd   :  { %4203 = vmatprep.subr.bf16.mxu1 %v4305_v22 }
 0x1de   :  { %v4351_v4 = vpop.eup %4350 }
 0x1df   :  { %4182 = vmatpush3.bf16.msra.mxu0 %v4306_v43  ;;  %v3003_v5 = vpack.c.bf16 %v4351_v4, %v4349_v0  ;;  %v4353_v10 = vpop.eup %4352 }
 0x1e0   :  { %4204 = vmatpush3.bf16.msra.mxu1 %v4307_v63  ;;  %4183 = vmatprep.subr.bf16.mxu0 %v4308_v59  ;;  %v4355_v13 = vpop.eup %4354 }
 0x1e1   :  { %3600 = vmatprep.mubr.bf16.mxu1 %v3003_v5  ;;  %4205 = vmatprep.subr.bf16.mxu1 %v4309_v1  ;;  %v4357_v14 = vpop.eup %4356 }
 0x1e2   :  { %v4359_v17 = vpop.eup %4358  ;;  %v3000_v19 = vpack.c.bf16 %v4353_v10, %v4357_v14 }
 0x1e3   :  { %4184 = vmatpush3.bf16.msra.mxu0 %v4310_v6  ;;  %v3002_v23 = vpack.c.bf16 %v4355_v13, %v4359_v17 }
 0x1e4   :  { %4206 = vmatpush3.bf16.msra.mxu1 %v4311_v8  ;;  %4213 = vmatprep.subr.bf16.mxu0 %v4312_v9 }
 0x1e5   :  { %4235 = vmatprep.subr.bf16.mxu1 %v4328_v11 }
 0x1e6   :  { %3560 = vmatmul.mubr.bf16.vlgmr.msra.gmra.mxu0 %v3000_v19 }
 0x1e7   :  { %3601 = vmatmul.mubr.bf16.vlgmr.msra.gmra.mxu1 %v3002_v23  ;;  %4214 = vmatpush3.bf16.msra.mxu0 %v4313_v15 }
 0x1e8   :  { %4215 = vmatprep.subr.bf16.mxu0 %v4314_v20  ;;  %4236 = vmatpush3.bf16.msra.mxu1 %v4329_v21 }
 0x1e9   :  { %4237 = vmatprep.subr.bf16.mxu1 %v4330_v37 }
 0x1eb   :  { %4216 = vmatpush3.bf16.msra.mxu0 %v4315_v24 }
 0x1ec   :  { %4217 = vmatprep.subr.bf16.mxu0 %v4316_v25  ;;  %4238 = vmatpush3.bf16.msra.mxu1 %v4331_v38  ;;  %v508_v25 = vsub.s32 7, %v4623_v44 }
 0x1ed   :  { %4239 = vmatprep.subr.bf16.mxu1 %v4332_v40 }
 0x1ef   :  { %4218 = vmatpush3.bf16.msra.mxu0 %v4317_v26  ;;  %v504_v26 = vsub.s32 6, %v4623_v44 }
 0x1f0   :  { %4219 = vmatprep.subr.bf16.mxu0 %v4318_v27  ;;  %4240 = vmatpush3.bf16.msra.mxu1 %v4333_v41 }
 0x1f1   :  { %4241 = vmatprep.subr.bf16.mxu1 %v4334_v42 }
 0x1f3   :  { %4220 = vmatpush3.bf16.msra.mxu0 %v4319_v29  ;;  %v509_v29 = vrot.slane %v4630_v55, %v508_v25 }
 0x1f4   :  { %4221 = vmatprep.subr.bf16.mxu0 %v4320_v30  ;;  %4242 = vmatpush3.bf16.msra.mxu1 %v4335_v16  ;;  %v505_v30 = vrot.slane %v4630_v55, %v504_v26 }
 0x1f5   :  { %4243 = vmatprep.subr.bf16.mxu1 %v4336_v56 }
 0x1f7   :  { %4222 = vmatpush3.bf16.msra.mxu0 %v4321_v31 }
 0x1f8   :  { %4223 = vmatprep.subr.bf16.mxu0 %v4322_v33  ;;  %4244 = vmatpush3.bf16.msra.mxu1 %v4337_v28 }
 0x1f9   :  { %4245 = vmatprep.subr.bf16.mxu1 %v4338_v46 }
 0x1fb   :  { %4224 = vmatpush3.bf16.msra.mxu0 %v4323_v18 }
 0x1fc   :  { %4225 = vmatprep.subr.bf16.mxu0 %v4324_v34  ;;  %4246 = vmatpush3.bf16.msra.mxu1 %v4339_v48 }
 0x1fd   :  { %4247 = vmatprep.subr.bf16.mxu1 %v4340_v49 }
 0x1ff   :  { %4226 = vmatpush3.bf16.msra.mxu0 %v4325_v45 }
 0x200   :  { %4227 = vmatprep.subr.bf16.mxu0 %v4326_v35  ;;  %4248 = vmatpush3.bf16.msra.mxu1 %v4341_v50 }
 0x201   :  { %4249 = vmatprep.subr.bf16.mxu1 %v4342_v51 }
 0x203   :  { %4228 = vmatpush3.bf16.msra.mxu0 %v4327_v36 }
 0x204   :  { %4250 = vmatpush3.bf16.msra.mxu1 %v4343_v7 }
 0x206   :  { %v2760_v52 = vpop.f32.mrf.mxu0 }
 0x207   :  { %v2803_v39 = vpop.f32.mrf.mxu1  ;;  %v2761_v61 = vadd.f32 %v2760_v52, %v497_v58 }
 0x208   :  { %v2762_v32 = vpop.f32.mrf.mxu0 }
 0x209   :  { %v2805_v47 = vpop.f32.mrf.mxu1  ;;  %v2763_v12 = vadd.f32 %v2762_v32, %v501_v2  ;;  %v2804_v4 = vadd.f32 %v2803_v39, %v2761_v61 }
 0x20a   :  { %v2764_v57 = vpop.f32.mrf.mxu0 }
 0x20b   :  { %v2765_v60 = vadd.f32 %v2764_v57, %v497_v58  ;;  %v2807_v62 = vpop.f32.mrf.mxu1  ;;  %v2806_v43 = vadd.f32 %v2805_v47, %v2763_v12 }
 0x20c   :  { %v2766_v3 = vpop.f32.mrf.mxu0 }
 0x20d   :  { %v2767_v63 = vadd.f32 %v2766_v3, %v501_v2  ;;  %v2808_v0 = vadd.f32 %v2807_v62, %v2765_v60  ;;  %v2809_v5 = vpop.f32.mrf.mxu1  ;;  %v4104_v62 = vld [vmem:[#allocation10] ss:$0 sm:$0xff] }
 0x20f   :  { %v2810_v8 = vadd.f32 %v2809_v5, %v2767_v63 }
 0x246   :  { %v2846_v22 = vpop.f32.mrf.mxu0 }
 0x247   :  { %v2847_v10 = vadd.f32 %v2846_v22, %v2804_v4  ;;  %v2889_v23 = vpop.f32.mrf.mxu1 }
 0x248   :  { %v2848_v59 = vpop.f32.mrf.mxu0  ;;  %v2890_v45 = vadd.f32 %v2889_v23, %v505_v30 }
 0x249   :  { %v2849_v1 = vadd.f32 %v2848_v59, %v2806_v43  ;;  %v2891_v24 = vpop.f32.mrf.mxu1 }
 0x24a   :  { %v2850_v6 = vpop.f32.mrf.mxu0  ;;  %v2892_v18 = vadd.f32 %v2891_v24, %v509_v29 }
 0x24b   :  { %v2851_v9 = vadd.f32 %v2850_v6, %v2808_v0  ;;  %4360 = vtanh.f32 %v2849_v1  ;;  %v2893_v27 = vpop.f32.mrf.mxu1 }
 0x24c   :  { %v2852_v11 = vpop.f32.mrf.mxu0  ;;  %v2894_v36 = vadd.f32 %v2893_v27, %v505_v30 }
 0x24d   :  { %v2853_v13 = vadd.f32 %v2852_v11, %v2810_v8  ;;  %4362 = vtanh.f32 %v2851_v9  ;;  %v2895_v31 = vpop.f32.mrf.mxu1 }
 0x24e   :  { %v2896_v42 = vadd.f32 %v2895_v31, %v509_v29 }
 0x24f   :  { %4364 = vtanh.f32 %v2853_v13 }
 0x250   :  { %4366 = vtanh.f32 %v2847_v10 }
 0x258   :  { %v4361_v14 = vpop.eup %4360 }
 0x25a   :  { %v4363_v15 = vpop.eup %4362 }
 0x25c   :  { %v4365_v17 = vpop.eup %4364 }
 0x25d   :  { %v4367_v19 = vpop.eup %4366  ;;  %v3005_v20 = vpack.c.bf16 %v4365_v17, %v4361_v14 }
 0x25e   :  { %v3004_v21 = vpack.c.bf16 %v4363_v15, %v4367_v19 }
 0x25f   :  { %3641 = vmatprep.mubr.bf16.mxu0 %v3005_v20 }
 0x260   :  { %3642 = vmatmul.mubr.bf16.vlgmr.msra.gmra.mxu0 %v3004_v21 }
 0x286   :  { %v2932_v33 = vpop.f32.mrf.mxu0 }
 0x287   :  { %v2975_v34 = vpop.f32.mrf.mxu1  ;;  %v2933_v40 = vadd.f32 %v2932_v33, %v2890_v45 }
 0x288   :  { %v2934_v35 = vpop.f32.mrf.mxu0 }
 0x289   :  { %v2935_v37 = vadd.f32 %v2934_v35, %v2892_v18  ;;  %v2977_v38 = vpop.f32.mrf.mxu1  ;;  %v2976_v49 = vadd.f32 %v2975_v34, %v2933_v40 }
 0x28a   :  { %v2936_v41 = vpop.f32.mrf.mxu0 }
 0x28b   :  { %v2978_v16 = vadd.f32 %v2977_v38, %v2935_v37  ;;  %v2937_v56 = vadd.f32 %v2936_v41, %v2894_v36  ;;  %v2979_v44 = vpop.f32.mrf.mxu1 }
 0x28c   :  { %v2938_v28 = vpop.f32.mrf.mxu0 }
 0x28d   :  { %v2980_v46 = vadd.f32 %v2979_v44, %v2937_v56  ;;  %v2939_v48 = vadd.f32 %v2938_v28, %v2896_v42  ;;  %v2981_v55 = vpop.f32.mrf.mxu1  ;;  %4368 = vtanh.f32 %v2978_v16 }
 0x28f   :  { %v2982_v50 = vadd.f32 %v2981_v55, %v2939_v48  ;;  %4370 = vtanh.f32 %v2980_v46 }
 0x291   :  { %4372 = vtanh.f32 %v2982_v50 }
 0x292   :  { %4374 = vtanh.f32 %v2976_v49 }
 0x29a   :  { %v4369_v51 = vpop.eup %4368 }
 0x29c   :  { %v4371_v7 = vpop.eup %4370 }
 0x29e   :  { %v4373_v52 = vpop.eup %4372 }
 0x29f   :  { %v4375_v53 = vpop.eup %4374  ;;  %v3007_v32 = vpack.c.bf16 %v4373_v52, %v4369_v51 }
 0x2a0   :  { %v3006_v54 = vpack.c.bf16 %v4371_v7, %v4375_v53 }
 0x2a1   :  { %3682 = vmatprep.mubr.bf16.mxu1 %v3007_v32 }
 0x2a2   :  { %3683 = vmatmul.mubr.bf16.vlgmr.msra.gmra.mxu1 %v3006_v54 }
 0x2a6   :  { %v4185_v39 = vpop.f32.mrf.mxu0 }
 0x2a7   :  { %v4207_v58 = vpop.f32.mrf.mxu1 }
 0x2a8   :  { %v4186_v2 = vpop.f32.mrf.mxu0 }
 0x2a9   :  { %v4208_v3 = vpop.f32.mrf.mxu1  ;;  %v4187_v61 = vadd.f32 %v4186_v2, %v4185_v39 }
 0x2aa   :  { %v4188_v57 = vpop.f32.mrf.mxu0  ;;  %v4209_v1 = vadd.f32 %v4208_v3, %v4207_v58 }
 0x2ab   :  { %v4210_v22 = vpop.f32.mrf.mxu1  ;;  %v3562_v63 = vadd.f32 %v4187_v61, %v4104_v62 }
 0x2ac   :  { %v4189_v47 = vpop.f32.mrf.mxu0 }
 0x2ad   :  { %v4190_v59 = vadd.f32 %v4189_v47, %v4188_v57  ;;  %v4211_v0 = vpop.f32.mrf.mxu1  ;;  %v3603_v8 = vadd.f32 %v4209_v1, %v3562_v63 }
 0x2ae   :  { %v4212_v11 = vadd.f32 %v4211_v0, %v4210_v22 }
 0x2af   :  { %v3565_v9 = vadd.f32 %v4190_v59, %v4104_v62 }
 0x2b1   :  { %v3606_v19 = vadd.f32 %v4212_v11, %v3565_v9 }
 0x320   :  { %v4229_v12 = vpop.f32.mrf.mxu0 }
 0x322   :  { %v4230_v60 = vpop.f32.mrf.mxu0 }
 0x323   :  { %v4231_v4 = vadd.f32 %v4230_v60, %v4229_v12 }
 0x324   :  { %v4232_v43 = vpop.f32.mrf.mxu0 }
 0x325   :  { %v3644_v13 = vadd.f32 %v4231_v4, %v3603_v8 }
 0x326   :  { %v4233_v5 = vpop.f32.mrf.mxu0 }
 0x327   :  { %v4234_v14 = vadd.f32 %v4233_v5, %v4232_v43 }
 0x329   :  { %v3647_v23 = vadd.f32 %v4234_v14, %v3606_v19 }
 0x362   :  { %v4251_v6 = vpop.f32.mrf.mxu1 }
 0x364   :  { %v4252_v10 = vpop.f32.mrf.mxu1 }
 0x365   :  { %v4253_v15 = vadd.f32 %v4252_v10, %v4251_v6 }
 0x366   :  { %v4254_v17 = vpop.f32.mrf.mxu1 }
 0x367   :  { %v3685_v20 = vadd.f32 %v4253_v15, %v3644_v13 }
 0x368   :  { %v4255_v21 = vpop.f32.mrf.mxu1 }
 0x369   :  { %4376 = vtanh.f32 %v3685_v20  ;;  %v4256_v24 = vadd.f32 %v4255_v21, %v4254_v17 }
 0x36b   :  { %v3688_v25 = vadd.f32 %v4256_v24, %v3647_v23 }
 0x36d   :  { %4378 = vtanh.f32 %v3688_v25 }
 0x376   :  { %v4377_v26 = vpop.eup %4376 }
 0x377   :  { %3693 = vst [vmem:[#allocation11] sm:$0xff] %v4377_v26 }
 0x37a   :  { %v4379_v27 = vpop.eup %4378 }
 0x37b   :  { %3694 = vst [vmem:[#allocation11 + $0x8] sm:$0xff] %v4379_v27 }
 0x37c   :  { %4498 = shalt.err (!%p4495_p1)
}
 0x37d   :  { %s4527_s23 = smov 128   ;;  %s4528_s24 = smov 8  }
 0x37e   :  { %3706 = dma.vmem_to_hbm [thread:$0]  %s3701_s4, 256, %s4670_s5, [#allocation4], %s4527_s23, %s4527_s23, %s4528_s24  }
 0x37f   :  { %4513 = dma.done.wait [#allocation4], 256  }
 0x380   :  { %4514 = vsyncadd [#allocation4], 4294967040 }
 0x381   :  { %3710 = vsyncpa [#allocation3], 1 }
 0x382   :  { %3711 = vsyncpa [#allocation6], 1 }
 0x383   :  { %3712 = vsyncpa [#allocation9], 1 }
 0x384   :  { %3713 = vsyncpa [#allocation4], 1 }

</bundles_post_ra>
